<compile_context>
chip_gen: v7x
topology: tpu7x:2x2x1
jax: 0.10.0
libtpu: 0.0.40
codegen_flags: <defaults>
</compile_context>

<pallas_src>
import functools

import jax
import jax.numpy as jnp
from jax import lax
from jax.experimental import pallas as pl
from jax.experimental.pallas import tpu as pltpu


def _round_up(x, m):
    return (x + m - 1) // m * m


def _pick_batch_block(B, max_bb=8):
    """Largest divisor of B that is <= max_bb while keeping grid length >= 2."""
    best = 1
    for bb in range(1, min(B, max_bb) + 1):
        if B % bb == 0 and B // bb >= 2:
            best = bb
    return best


def _mha_kernel(x_ref, wqkv_ref, wo_ref, bo_ref, o_ref, heads_scr,
                *, num_heads, hs_p, sm_scale):
    # x_ref   : (Bb, T, Cp)          wqkv_ref : (Cp, 3*H*hs_p)
    # wo_ref  : (H*hs_p, Cp)         bo_ref   : (1, Cp)
    # o_ref   : (Bb, T, Cp)          heads_scr: (T, H*hs_p) VMEM scratch
    Bb, T, Cp = x_ref.shape
    H = num_heads
    cdt = x_ref.dtype                          # MXU operand dtype (f32 or bf16)

    # causal mask, shared across heads / rows
    row = lax.broadcasted_iota(jnp.int32, (T, T), 0)
    col = lax.broadcasted_iota(jnp.int32, (T, T), 1)
    causal = row >= col
    neg_big = jnp.float32(-1e30)               # exp(neg_big - m) underflows to 0

    bias = bo_ref[...].astype(jnp.float32)     # (1, Cp), broadcasts over T

    for b in range(Bb):                        # short static loop over batch rows
        x = x_ref[b]                           # (T, Cp)

        # fused QKV projection: one big K=Cp matmul
        qkv = jnp.dot(x, wqkv_ref[...],
                      preferred_element_type=jnp.float32)      # (T, 3*H*hs_p)
        qkv = qkv.astype(cdt)

        for h in range(H):                     # static unroll; H is small
            q = qkv[:, (0 * H + h) * hs_p:(0 * H + h + 1) * hs_p]   # (T, hs_p)
            k = qkv[:, (1 * H + h) * hs_p:(1 * H + h + 1) * hs_p]
            v = qkv[:, (2 * H + h) * hs_p:(2 * H + h + 1) * hs_p]

            # scores: contract both operands on their last dim (no k transpose)
            s = lax.dot_general(q, k, (((1,), (1,)), ((), ())),
                                preferred_element_type=jnp.float32)  # (T, T)
            s = s * sm_scale
            s = jnp.where(causal, s, neg_big)

            m = jnp.max(s, axis=-1, keepdims=True)
            p = jnp.exp(s - m)                                       # unnormalized
            l = jnp.sum(p, axis=-1, keepdims=True)
            # attention dropout: identity in eval mode

            o_h = jnp.dot(p.astype(cdt), v,
                          preferred_element_type=jnp.float32)        # (T, hs_p)
            o_h = o_h * pl.reciprocal(l, approx=True)                # post-PV norm

            # 128-aligned lane slice write into the concat-heads scratch
            heads_scr[:, h * hs_p:(h + 1) * hs_p] = o_h.astype(heads_scr.dtype)

        # single K = H*hs_p output projection + bias
        y = jnp.dot(heads_scr[...], wo_ref[...],
                    preferred_element_type=jnp.float32)              # (T, Cp)
        o_ref[b] = (y + bias).astype(o_ref.dtype)   # output dropout: identity (eval)


@jax.jit
def multi_head_attention(x, wq, wk, wv, wo, bo):
    """Eval-mode causal MultiHeadAttention.  x: [B, T, C] -> [B, T, C]."""
    B, T, C = x.shape
    H, _, hs = wq.shape
    assert wo.shape == (H * hs, C) and bo.shape == (C,)

    Cp = _round_up(C, 128)       # lane-dense model dim
    hs_p = _round_up(hs, 128)    # lane-dense head dim
    pc, ph = Cp - C, hs_p - hs

    # activations: pad model dim with zeros (exact)
    x_p = jnp.pad(x, ((0, 0), (0, 0), (0, pc))) if pc else x

    # fused QKV weight: (Cp, 3*H*hs_p), column layout ((q|k|v), head, lane)
    def pad_w(w):                                   # (H, C, hs) -> (H, Cp, hs_p)
        return jnp.pad(w, ((0, 0), (0, pc), (0, ph)))
    wqkv = jnp.stack([pad_w(wq), pad_w(wk), pad_w(wv)], axis=0)   # (3, H, Cp, hs_p)
    wqkv = wqkv.transpose(2, 0, 1, 3).reshape(Cp, 3 * H * hs_p)

    # output projection: (H*hs, C) -> zero-pad per-head hs rows and C cols
    wo3 = wo.reshape(H, hs, C)
    wo_p = jnp.pad(wo3, ((0, 0), (0, ph), (0, pc))).reshape(H * hs_p, Cp)
    bo_p = (jnp.pad(bo, ((0, pc),)) if pc else bo).reshape(1, Cp)

    Bb = _pick_batch_block(B)            # rows per grid step; grid stays >= 2
    grid = (B // Bb,)

    kernel = functools.partial(_mha_kernel, num_heads=H, hs_p=hs_p,
                               sm_scale=float(hs) ** -0.5)

    itemsize = x.dtype.itemsize
    flops = int(B * (2 * T * Cp * (3 * H * hs_p)          # fused QKV projection
                     + H * (4 * T * T * hs_p)             # scores + attn @ V
                     + 2 * T * (H * hs_p) * Cp))          # output projection
    bytes_accessed = int(itemsize * (x_p.size + B * T * Cp
                                     + wqkv.size + wo_p.size + bo_p.size))
    cost = pl.CostEstimate(flops=flops,
                           transcendentals=int(B * H * T * (T + 1)),
                           bytes_accessed=bytes_accessed)

    out = pl.pallas_call(
        kernel,
        out_shape=jax.ShapeDtypeStruct((B, T, Cp), x.dtype),
        grid_spec=pltpu.PrefetchScalarGridSpec(
            num_scalar_prefetch=0,
            grid=grid,
            in_specs=[
                pl.BlockSpec((Bb, T, Cp), lambda b: (b, 0, 0)),        # x rows
                pl.BlockSpec((Cp, 3 * H * hs_p), lambda b: (0, 0)),    # Wqkv (resident)
                pl.BlockSpec((H * hs_p, Cp), lambda b: (0, 0)),        # Wo   (resident)
                pl.BlockSpec((1, Cp), lambda b: (0, 0)),               # bo
            ],
            out_specs=pl.BlockSpec((Bb, T, Cp), lambda b: (b, 0, 0)),
            scratch_shapes=[pltpu.VMEM((T, H * hs_p), x.dtype)],       # concat heads
        ),
        compiler_params=pltpu.CompilerParams(
            dimension_semantics=("parallel",),
        ),
        cost_estimate=cost,
    )(x_p, wqkv, wo_p, bo_p)

    return out[..., :C]


def mha_reference(x, wq, wk, wv, wo, bo):
    """Pure-JAX eval-mode reference matching the PyTorch module."""
    B, T, C = x.shape
    H, _, hs = wq.shape
    q = jnp.einsum('btc,hcd->bhtd', x, wq)
    k = jnp.einsum('btc,hcd->bhtd', x, wk)
    v = jnp.einsum('btc,hcd->bhtd', x, wv)
    s = jnp.einsum('bhtd,bhsd->bhts', q, k) * (hs ** -0.5)
    mask = jnp.tril(jnp.ones((T, T), dtype=bool))
    s = jnp.where(mask, s, -jnp.inf)
    p = jax.nn.softmax(s, axis=-1)
    o = jnp.einsum('bhts,bhsd->bhtd', p, v)
    o = o.transpose(0, 2, 1, 3).reshape(B, T, H * hs)    # concat heads
    return o @ wo + bo


def init_params(key, n_embd, num_heads, dtype=jnp.float32):
    """nn.Linear-style uniform(+-1/sqrt(fan_in)) init, kernel-friendly layouts."""
    hs = n_embd // num_heads
    kq, kk, kv, kw, kb = jax.random.split(key, 5)
    lim_in = 1.0 / (n_embd ** 0.5)
    lim_pr = 1.0 / ((num_heads * hs) ** 0.5)
    wq = jax.random.uniform(kq, (num_heads, n_embd, hs), dtype, -lim_in, lim_in)
    wk = jax.random.uniform(kk, (num_heads, n_embd, hs), dtype, -lim_in, lim_in)
    wv = jax.random.uniform(kv, (num_heads, n_embd, hs), dtype, -lim_in, lim_in)
    wo = jax.random.uniform(kw, (num_heads * hs, n_embd), dtype, -lim_pr, lim_pr)
    bo = jax.random.uniform(kb, (n_embd,), dtype, -lim_pr, lim_pr)
    return wq, wk, wv, wo, bo


if __name__ == "__main__":
    N_EMBD = 140                       # from the spec
    NUM_HEADS = 4
    HEAD_SIZE = N_EMBD // NUM_HEADS    # 35; concat of heads == N_EMBD (GPT convention)
    B, T = 2, 16                       # small demo; T <= BLOCK_SIZE = 256

    key = jax.random.PRNGKey(0)
    kx, kp = jax.random.split(key)
    x = jax.random.normal(kx, (B, T, N_EMBD), jnp.float32)
    wq, wk, wv, wo, bo = init_params(kp, N_EMBD, NUM_HEADS)

    y = multi_head_attention(x, wq, wk, wv, wo, bo)
    jax.block_until_ready(y)
    assert y.shape == (B, T, N_EMBD)

    ref = mha_reference(x, wq, wk, wv, wo, bo)
    max_err = float(jnp.max(jnp.abs(y - ref)))
    # tolerance covers TPU default-precision matmuls in the XLA reference path
    # and the approx-EUP reciprocal used for the softmax normalizer
    assert jnp.allclose(y, ref, atol=5e-2, rtol=5e-2), max_err
    print("KERNEL_OK")
</pallas_src>

<mosaic_0001>
module attributes {stable_mosaic.version = 11 : i64} {
  func.func @_mha_kernel(%arg0: i32, %arg1: memref<1x16x256xf32, #tpu.memory_space<vmem>>, %arg2: memref<256x1536xf32, #tpu.memory_space<vmem>>, %arg3: memref<512x256xf32, #tpu.memory_space<vmem>>, %arg4: memref<1x256xf32, #tpu.memory_space<vmem>>, %arg5: memref<1x16x256xf32, #tpu.memory_space<vmem>>, %arg6: memref<16x512xf32, #tpu.memory_space<vmem>>) attributes {dimension_semantics = [#tpu.dimension_semantics<parallel>], iteration_bounds = array<i64: 2>, scalar_prefetch = 0 : i64, scratch_operands = 1 : i64, tpu.core_type = #tpu.core_type<tc>, window_params = [{transform_indices = @transform_0, window_bounds = array<i64: 1, 16, 256>}, {pipeline_mode = #tpu.pipeline_mode<synchronous>, transform_indices = @transform_1, window_bounds = array<i64: 256, 1536>}, {pipeline_mode = #tpu.pipeline_mode<synchronous>, transform_indices = @transform_2, window_bounds = array<i64: 512, 256>}, {pipeline_mode = #tpu.pipeline_mode<synchronous>, transform_indices = @transform_3, window_bounds = array<i64: 1, 256>}, {transform_indices = @transform_4, window_bounds = array<i64: 1, 16, 256>}]} {
    %0 = tpu.iota {dimensions = array<i32: 0>} : vector<16x16xi32>
    %1 = tpu.iota {dimensions = array<i32: 1>} : vector<16x16xi32>
    %2 = arith.cmpi sge, %0, %1 : vector<16x16xi32>
    %c0 = arith.constant 0 : index
    %c0_0 = arith.constant 0 : index
    %3 = vector.load %arg4[%c0, %c0_0] : memref<1x256xf32, #tpu.memory_space<vmem>>, vector<1x256xf32>
    %c0_1 = arith.constant 0 : index
    %c0_2 = arith.constant 0 : index
    %c0_3 = arith.constant 0 : index
    %4 = vector.load %arg1[%c0_1, %c0_2, %c0_3] : memref<1x16x256xf32, #tpu.memory_space<vmem>>, vector<1x16x256xf32>
    %5 = vector.shape_cast %4 : vector<1x16x256xf32> to vector<16x256xf32>
    %c0_4 = arith.constant 0 : index
    %c0_5 = arith.constant 0 : index
    %6 = vector.load %arg2[%c0_4, %c0_5] : memref<256x1536xf32, #tpu.memory_space<vmem>>, vector<256x1536xf32>
    %cst = arith.constant dense<0.000000e+00> : vector<16x1536xf32>
    %7 = tpu.matmul %5, %6, %cst {dimension_numbers = #tpu.dot_dimension_numbers<[1], [0], [0], [1], [0, 0, 1, 1], [], []>} : vector<16x256xf32>, vector<256x1536xf32>, vector<16x1536xf32> -> vector<16x1536xf32>
    %8 = vector.extract_strided_slice %7 {offsets = [0, 0], sizes = [16, 128], strides = [1, 1]} : vector<16x1536xf32> to vector<16x128xf32>
    %9 = vector.extract_strided_slice %7 {offsets = [0, 512], sizes = [16, 128], strides = [1, 1]} : vector<16x1536xf32> to vector<16x128xf32>
    %10 = vector.extract_strided_slice %7 {offsets = [0, 1024], sizes = [16, 128], strides = [1, 1]} : vector<16x1536xf32> to vector<16x128xf32>
    %cst_6 = arith.constant dense<0.000000e+00> : vector<16x16xf32>
    %11 = tpu.matmul %8, %9, %cst_6 {dimension_numbers = #tpu.dot_dimension_numbers<[1], [1], [0], [0], [0, 0, 1, 0], [], []>} : vector<16x128xf32>, vector<16x128xf32>, vector<16x16xf32> -> vector<16x16xf32>
    %cst_7 = arith.constant 0.169030845 : f32
    %12 = vector.broadcast %cst_7 : f32 to vector<16x16xf32>
    %13 = arith.mulf %11, %12 : vector<16x16xf32>
    %cst_8 = arith.constant -1.000000e+30 : f32
    %14 = vector.broadcast %cst_8 : f32 to vector<16x16xf32>
    %15 = arith.select %2, %13, %14 : vector<16x16xi1>, vector<16x16xf32>
    %cst_9 = arith.constant dense<0xFF800000> : vector<16xf32>
    %16 = vector.multi_reduction <maximumf>, %15, %cst_9 [1] : vector<16x16xf32> to vector<16xf32>
    %17 = vector.shape_cast %16 : vector<16xf32> to vector<16x1xf32>
    %18 = vector.broadcast %17 : vector<16x1xf32> to vector<16x16xf32>
    %19 = arith.subf %15, %18 : vector<16x16xf32>
    %20 = math.exp %19 : vector<16x16xf32>
    %cst_10 = arith.constant dense<0.000000e+00> : vector<16xf32>
    %21 = vector.multi_reduction <add>, %20, %cst_10 [1] : vector<16x16xf32> to vector<16xf32>
    %22 = vector.shape_cast %21 : vector<16xf32> to vector<16x1xf32>
    %cst_11 = arith.constant dense<0.000000e+00> : vector<16x128xf32>
    %23 = tpu.matmul %20, %10, %cst_11 {dimension_numbers = #tpu.dot_dimension_numbers<[1], [0], [0], [1], [0, 0, 1, 1], [], []>} : vector<16x16xf32>, vector<16x128xf32>, vector<16x128xf32> -> vector<16x128xf32>
    %24 = tpu.reciprocal %22 {approx = true} : vector<16x1xf32> -> vector<16x1xf32>
    %25 = vector.broadcast %24 : vector<16x1xf32> to vector<16x128xf32>
    %26 = arith.mulf %23, %25 : vector<16x128xf32>
    %c0_12 = arith.constant 0 : index
    %c0_13 = arith.constant 0 : index
    %27 = vector.load %arg6[%c0_12, %c0_13] : memref<16x512xf32, #tpu.memory_space<vmem>>, vector<16x128xf32>
    tpu.vector_store %arg6[%c0_12, %c0_13], %26 {strides = array<i32>} : memref<16x512xf32, #tpu.memory_space<vmem>>, vector<16x128xf32>,
    %28 = vector.extract_strided_slice %7 {offsets = [0, 128], sizes = [16, 128], strides = [1, 1]} : vector<16x1536xf32> to vector<16x128xf32>
    %29 = vector.extract_strided_slice %7 {offsets = [0, 640], sizes = [16, 128], strides = [1, 1]} : vector<16x1536xf32> to vector<16x128xf32>
    %30 = vector.extract_strided_slice %7 {offsets = [0, 1152], sizes = [16, 128], strides = [1, 1]} : vector<16x1536xf32> to vector<16x128xf32>
    %cst_14 = arith.constant dense<0.000000e+00> : vector<16x16xf32>
    %31 = tpu.matmul %28, %29, %cst_14 {dimension_numbers = #tpu.dot_dimension_numbers<[1], [1], [0], [0], [0, 0, 1, 0], [], []>} : vector<16x128xf32>, vector<16x128xf32>, vector<16x16xf32> -> vector<16x16xf32>
    %cst_15 = arith.constant 0.169030845 : f32
    %32 = vector.broadcast %cst_15 : f32 to vector<16x16xf32>
    %33 = arith.mulf %31, %32 : vector<16x16xf32>
    %cst_16 = arith.constant -1.000000e+30 : f32
    %34 = vector.broadcast %cst_16 : f32 to vector<16x16xf32>
    %35 = arith.select %2, %33, %34 : vector<16x16xi1>, vector<16x16xf32>
    %cst_17 = arith.constant dense<0xFF800000> : vector<16xf32>
    %36 = vector.multi_reduction <maximumf>, %35, %cst_17 [1] : vector<16x16xf32> to vector<16xf32>
    %37 = vector.shape_cast %36 : vector<16xf32> to vector<16x1xf32>
    %38 = vector.broadcast %37 : vector<16x1xf32> to vector<16x16xf32>
    %39 = arith.subf %35, %38 : vector<16x16xf32>
    %40 = math.exp %39 : vector<16x16xf32>
    %cst_18 = arith.constant dense<0.000000e+00> : vector<16xf32>
    %41 = vector.multi_reduction <add>, %40, %cst_18 [1] : vector<16x16xf32> to vector<16xf32>
    %42 = vector.shape_cast %41 : vector<16xf32> to vector<16x1xf32>
    %cst_19 = arith.constant dense<0.000000e+00> : vector<16x128xf32>
    %43 = tpu.matmul %40, %30, %cst_19 {dimension_numbers = #tpu.dot_dimension_numbers<[1], [0], [0], [1], [0, 0, 1, 1], [], []>} : vector<16x16xf32>, vector<16x128xf32>, vector<16x128xf32> -> vector<16x128xf32>
    %44 = tpu.reciprocal %42 {approx = true} : vector<16x1xf32> -> vector<16x1xf32>
    %45 = vector.broadcast %44 : vector<16x1xf32> to vector<16x128xf32>
    %46 = arith.mulf %43, %45 : vector<16x128xf32>
    %c0_20 = arith.constant 0 : index
    %c128 = arith.constant 128 : index
    %47 = vector.load %arg6[%c0_20, %c128] : memref<16x512xf32, #tpu.memory_space<vmem>>, vector<16x128xf32>
    tpu.vector_store %arg6[%c0_20, %c128], %46 {strides = array<i32>} : memref<16x512xf32, #tpu.memory_space<vmem>>, vector<16x128xf32>,
    %48 = vector.extract_strided_slice %7 {offsets = [0, 256], sizes = [16, 128], strides = [1, 1]} : vector<16x1536xf32> to vector<16x128xf32>
    %49 = vector.extract_strided_slice %7 {offsets = [0, 768], sizes = [16, 128], strides = [1, 1]} : vector<16x1536xf32> to vector<16x128xf32>
    %50 = vector.extract_strided_slice %7 {offsets = [0, 1280], sizes = [16, 128], strides = [1, 1]} : vector<16x1536xf32> to vector<16x128xf32>
    %cst_21 = arith.constant dense<0.000000e+00> : vector<16x16xf32>
    %51 = tpu.matmul %48, %49, %cst_21 {dimension_numbers = #tpu.dot_dimension_numbers<[1], [1], [0], [0], [0, 0, 1, 0], [], []>} : vector<16x128xf32>, vector<16x128xf32>, vector<16x16xf32> -> vector<16x16xf32>
    %cst_22 = arith.constant 0.169030845 : f32
    %52 = vector.broadcast %cst_22 : f32 to vector<16x16xf32>
    %53 = arith.mulf %51, %52 : vector<16x16xf32>
    %cst_23 = arith.constant -1.000000e+30 : f32
    %54 = vector.broadcast %cst_23 : f32 to vector<16x16xf32>
    %55 = arith.select %2, %53, %54 : vector<16x16xi1>, vector<16x16xf32>
    %cst_24 = arith.constant dense<0xFF800000> : vector<16xf32>
    %56 = vector.multi_reduction <maximumf>, %55, %cst_24 [1] : vector<16x16xf32> to vector<16xf32>
    %57 = vector.shape_cast %56 : vector<16xf32> to vector<16x1xf32>
    %58 = vector.broadcast %57 : vector<16x1xf32> to vector<16x16xf32>
    %59 = arith.subf %55, %58 : vector<16x16xf32>
    %60 = math.exp %59 : vector<16x16xf32>
    %cst_25 = arith.constant dense<0.000000e+00> : vector<16xf32>
    %61 = vector.multi_reduction <add>, %60, %cst_25 [1] : vector<16x16xf32> to vector<16xf32>
    %62 = vector.shape_cast %61 : vector<16xf32> to vector<16x1xf32>
    %cst_26 = arith.constant dense<0.000000e+00> : vector<16x128xf32>
    %63 = tpu.matmul %60, %50, %cst_26 {dimension_numbers = #tpu.dot_dimension_numbers<[1], [0], [0], [1], [0, 0, 1, 1], [], []>} : vector<16x16xf32>, vector<16x128xf32>, vector<16x128xf32> -> vector<16x128xf32>
    %64 = tpu.reciprocal %62 {approx = true} : vector<16x1xf32> -> vector<16x1xf32>
    %65 = vector.broadcast %64 : vector<16x1xf32> to vector<16x128xf32>
    %66 = arith.mulf %63, %65 : vector<16x128xf32>
    %c0_27 = arith.constant 0 : index
    %c256 = arith.constant 256 : index
    %67 = vector.load %arg6[%c0_27, %c256] : memref<16x512xf32, #tpu.memory_space<vmem>>, vector<16x128xf32>
    tpu.vector_store %arg6[%c0_27, %c256], %66 {strides = array<i32>} : memref<16x512xf32, #tpu.memory_space<vmem>>, vector<16x128xf32>,
    %68 = vector.extract_strided_slice %7 {offsets = [0, 384], sizes = [16, 128], strides = [1, 1]} : vector<16x1536xf32> to vector<16x128xf32>
    %69 = vector.extract_strided_slice %7 {offsets = [0, 896], sizes = [16, 128], strides = [1, 1]} : vector<16x1536xf32> to vector<16x128xf32>
    %70 = vector.extract_strided_slice %7 {offsets = [0, 1408], sizes = [16, 128], strides = [1, 1]} : vector<16x1536xf32> to vector<16x128xf32>
    %cst_28 = arith.constant dense<0.000000e+00> : vector<16x16xf32>
    %71 = tpu.matmul %68, %69, %cst_28 {dimension_numbers = #tpu.dot_dimension_numbers<[1], [1], [0], [0], [0, 0, 1, 0], [], []>} : vector<16x128xf32>, vector<16x128xf32>, vector<16x16xf32> -> vector<16x16xf32>
    %cst_29 = arith.constant 0.169030845 : f32
    %72 = vector.broadcast %cst_29 : f32 to vector<16x16xf32>
    %73 = arith.mulf %71, %72 : vector<16x16xf32>
    %cst_30 = arith.constant -1.000000e+30 : f32
    %74 = vector.broadcast %cst_30 : f32 to vector<16x16xf32>
    %75 = arith.select %2, %73, %74 : vector<16x16xi1>, vector<16x16xf32>
    %cst_31 = arith.constant dense<0xFF800000> : vector<16xf32>
    %76 = vector.multi_reduction <maximumf>, %75, %cst_31 [1] : vector<16x16xf32> to vector<16xf32>
    %77 = vector.shape_cast %76 : vector<16xf32> to vector<16x1xf32>
    %78 = vector.broadcast %77 : vector<16x1xf32> to vector<16x16xf32>
    %79 = arith.subf %75, %78 : vector<16x16xf32>
    %80 = math.exp %79 : vector<16x16xf32>
    %cst_32 = arith.constant dense<0.000000e+00> : vector<16xf32>
    %81 = vector.multi_reduction <add>, %80, %cst_32 [1] : vector<16x16xf32> to vector<16xf32>
    %82 = vector.shape_cast %81 : vector<16xf32> to vector<16x1xf32>
    %cst_33 = arith.constant dense<0.000000e+00> : vector<16x128xf32>
    %83 = tpu.matmul %80, %70, %cst_33 {dimension_numbers = #tpu.dot_dimension_numbers<[1], [0], [0], [1], [0, 0, 1, 1], [], []>} : vector<16x16xf32>, vector<16x128xf32>, vector<16x128xf32> -> vector<16x128xf32>
    %84 = tpu.reciprocal %82 {approx = true} : vector<16x1xf32> -> vector<16x1xf32>
    %85 = vector.broadcast %84 : vector<16x1xf32> to vector<16x128xf32>
    %86 = arith.mulf %83, %85 : vector<16x128xf32>
    %c0_34 = arith.constant 0 : index
    %c384 = arith.constant 384 : index
    %87 = vector.load %arg6[%c0_34, %c384] : memref<16x512xf32, #tpu.memory_space<vmem>>, vector<16x128xf32>
    tpu.vector_store %arg6[%c0_34, %c384], %86 {strides = array<i32>} : memref<16x512xf32, #tpu.memory_space<vmem>>, vector<16x128xf32>,
    %c0_35 = arith.constant 0 : index
    %c0_36 = arith.constant 0 : index
    %88 = vector.load %arg6[%c0_35, %c0_36] : memref<16x512xf32, #tpu.memory_space<vmem>>, vector<16x512xf32>
    %c0_37 = arith.constant 0 : index
    %c0_38 = arith.constant 0 : index
    %89 = vector.load %arg3[%c0_37, %c0_38] : memref<512x256xf32, #tpu.memory_space<vmem>>, vector<512x256xf32>
    %cst_39 = arith.constant dense<0.000000e+00> : vector<16x256xf32>
    %90 = tpu.matmul %88, %89, %cst_39 {dimension_numbers = #tpu.dot_dimension_numbers<[1], [0], [0], [1], [0, 0, 1, 1], [], []>} : vector<16x512xf32>, vector<512x256xf32>, vector<16x256xf32> -> vector<16x256xf32>
    %91 = vector.broadcast %3 : vector<1x256xf32> to vector<16x256xf32>
    %92 = arith.addf %90, %91 : vector<16x256xf32>
    %c0_40 = arith.constant 0 : index
    %c0_41 = arith.constant 0 : index
    %c0_42 = arith.constant 0 : index
    %93 = vector.load %arg5[%c0_40, %c0_41, %c0_42] : memref<1x16x256xf32, #tpu.memory_space<vmem>>, vector<1x16x256xf32>
    %94 = vector.shape_cast %93 : vector<1x16x256xf32> to vector<16x256xf32>
    %95 = vector.shape_cast %92 : vector<16x256xf32> to vector<1x16x256xf32>
    tpu.vector_store %arg5[%c0_40, %c0_41, %c0_42], %95 {strides = array<i32>} : memref<1x16x256xf32, #tpu.memory_space<vmem>>, vector<1x16x256xf32>,
    return
  }
  func.func @transform_0(%arg0: i32) -> (i32, i32, i32) {
    %c0_i32 = arith.constant 0 : i32
    %c0_i32_0 = arith.constant 0 : i32
    %c0_i32_1 = arith.constant 0 : i32
    return %arg0, %c0_i32, %c0_i32_0 : i32, i32, i32
  }
  func.func @transform_1(%arg0: i32) -> (i32, i32) {
    %c0_i32 = arith.constant 0 : i32
    %c0_i32_0 = arith.constant 0 : i32
    %c0_i32_1 = arith.constant 0 : i32
    return %c0_i32, %c0_i32_0 : i32, i32
  }
  func.func @transform_2(%arg0: i32) -> (i32, i32) {
    %c0_i32 = arith.constant 0 : i32
    %c0_i32_0 = arith.constant 0 : i32
    %c0_i32_1 = arith.constant 0 : i32
    return %c0_i32, %c0_i32_0 : i32, i32
  }
  func.func @transform_3(%arg0: i32) -> (i32, i32) {
    %c0_i32 = arith.constant 0 : i32
    %c0_i32_0 = arith.constant 0 : i32
    %c0_i32_1 = arith.constant 0 : i32
    return %c0_i32, %c0_i32_0 : i32, i32
  }
  func.func @transform_4(%arg0: i32) -> (i32, i32, i32) {
    %c0_i32 = arith.constant 0 : i32
    %c0_i32_0 = arith.constant 0 : i32
    %c0_i32_1 = arith.constant 0 : i32
    return %arg0, %c0_i32, %c0_i32_0 : i32, i32, i32
  }
}

</mosaic_0001>

<bundles_post_ra>
// kernel: multi_head_attention.1
= control target key start
LH: loop header
LB: loop body
LE: loop exit
PB: predicated region body
PF: predicated region fallthrough
CT: control target
= control target key end

     0   :  { %9 = vsyncpa [#allocation4], 0  ;;  %s4800_s0 = inlined_call_operand.vmem [shape: f32[2,16,256], index: 0, kind: input, shape index: {}]   ;;  %s4801_s1 = inlined_call_operand.vmem [shape: f32[256,1536], index: 1, kind: input, shape index: {}]   ;;  %s4802_s2 = inlined_call_operand.vmem [shape: f32[512,256], index: 2, kind: input, shape index: {}]   ;;  %s4803_s3 = inlined_call_operand.vmem [shape: f32[1,256], index: 3, kind: input, shape index: {}]   ;;  %s4804_s4 = inlined_call_operand.hbm [shape: f32[2,16,256], index: 4, kind: output, shape index: {}]  }
   0x1   :  { %11 = vsyncpa [#allocation4 + $0x1], 0  ;;  %s3003_s15 = smov 0   ;;  %s3005_s16 = smov 0  }
   0x2   :  { %s3007_s17 = smov 0   ;;  %s3009_s18 = smov 0  }
   0x3 LB: > { %s3024_s19 = sadd.s32 4294967295, %s2973_s18   ;;  %s2172_s20 = sadd.s32 4294967294, %s2973_s18   ;;  %s2973_s18 = sphi %s3009_s18, %s4810_s18   ;;  %s2969_s17 = sphi %s3007_s17, %s4809_s17   ;;  %s2965_s16 = sphi %s3005_s16, %s4808_s16   ;;  %s2961_s15 = sphi %s3003_s15, %s4807_s15  }
   0x4   : > { %s3028_s21 = sadd.s32 1, %s2973_s18   ;;  %s113_s22 = sadd.s32 1, %s2969_s17 }
   0x5   : > { %s110_s23 = ssub.s32 %s2973_s18, %s3028_s21  ;;  %p123_p0 = scmp.ne.s32.totalorder %s2969_s17, %s2965_s16 }
   0x6   : > { %p111_p1 = scmp.eq.s32.totalorder %s110_s23, 0  ;;  %p124_p2 = scmp.eq.s32.totalorder %s3024_s19, 1 }
   0x7   : > { %p129_p3 = scmp.ne.s32.totalorder %s2965_s16, %s2961_s15  ;;  %p130_p4 = scmp.eq.s32.totalorder %s2172_s20, 1 }
   0x8   : > { %s3039_s24 = scalar_select %p111_p1, %s2969_s17, %s113_s22  }
   0x9   : > { %p3041_p5 = por %p124_p2, %p123_p0  ;;  %p3045_p6 = por %p130_p4, %p129_p3 }
   0xa   : > { %p2175_p7 = scmp.ge.s32.totalorder %s2973_s18, 1  ;;  %p165_p8 = scmp.lt.s32.totalorder %s2973_s18, 3 }
   0xc   : > { %p166_p9 = pnand %p2175_p7, %p165_p8 }
   0xd   : > { %v209_v0 = vld [vmem:[%s4801_s1 + $0x8] sm:$0xff] (!%p166_p9)  ;;  %v208_v2 = vld [vmem:[%s4801_s1] sm:$0xff] (!%p166_p9)  ;;  %p191_p10 = scmp.lt.s32.totalorder (!%p166_p9), %s3024_s19, 1  ;;  %vm1133_vm1 = vcmask (!%p166_p9), 130048   ;;  %s188_s14 = sand.u32 (!%p166_p9), 1, %s2965_s16  }
   0xe   : > { %169 = sbr.rel (%p166_p9) target bundleno = 2038 (0x7f6), region = 36  ;;  %v221_v1 = vld [vmem:[%s4801_s1 + $0x68] sm:$0xff] (!%p166_p9)  ;;  %v220_v4 = vld [vmem:[%s4801_s1 + $0x60] sm:$0xff] (!%p166_p9)  ;;  %s2176_s23 = sshll.u32 (!%p166_p9), %s188_s14, 5 }
   0xf   : > { %v2282_v3 = vpack.c.bf16 (!%p166_p9), %v221_v1, %v209_v0  ;;  %v233_v5 = vld [vmem:[%s4801_s1 + $0xc8] sm:$0xff] (!%p166_p9)  ;;  %v2284_v7 = vpack.c.bf16 (!%p166_p9), %v220_v4, %v208_v2  ;;  %v232_v9 = vld [vmem:[%s4801_s1 + $0xc0] sm:$0xff] (!%p166_p9)  ;;  %s190_s27 = scalar_lea.vmem (!%p166_p9), [#allocation3], %s2176_s23  ;;  %s2193_s30 = sshll.u32 (!%p166_p9), %s3024_s19, 9 }
  0x10   : > { %v245_v6 = vld [vmem:[%s4801_s1 + $0x128] sm:$0xff] (!%p166_p9)  ;;  %v244_v10 = vld [vmem:[%s4801_s1 + $0x120] sm:$0xff] (!%p166_p9)  ;;  %s2110_s28 = sshll.u32 (!%p166_p9), %s190_s27, 4  ;;  %s4759_s7 = scalar_lea.sflag (!%p166_p9), [#allocation4], %s188_s14  ;;  %s4752_s28 = int_to_ptr.vmem [resolvable:$true] %s2110_s28 }
  0x11   : > { %v2286_v8 = vpack.c.bf16 (!%p166_p9), %v245_v6, %v233_v5  ;;  %v257_v11 = vld [vmem:[%s4801_s1 + $0x188] sm:$0xff] (!%p166_p9)  ;;  %2283 = vmatprep.subr.bf16.mxu0 (!%p166_p9), %v2282_v3  ;;  %v2288_v13 = vpack.c.bf16 (!%p166_p9), %v244_v10, %v232_v9  ;;  %v256_v15 = vld [vmem:[%s4801_s1 + $0x180] sm:$0xff] (!%p166_p9)  ;;  %s2975_s8 = smov (!%p166_p9), [#allocation3]  }
  0x12   : > { %v269_v12 = vld [vmem:[%s4801_s1 + $0x1e8] sm:$0xff] (!%p166_p9)  ;;  %2285 = vmatpush1.bf16.msra.mxu0 (!%p166_p9), %v2284_v7  ;;  %v268_v16 = vld [vmem:[%s4801_s1 + $0x1e0] sm:$0xff] (!%p166_p9)  ;;  %s2915_s9 = sshll.u32 (!%p166_p9), %s2975_s8, 4  ;;  %s2916_s9 = int_to_ptr.vmem [resolvable:$false] %s2915_s9 }
  0x13   : > { %2287 = vmatprep.subr.bf16.mxu0 (!%p166_p9), %v2286_v8  ;;  %v2290_v14 = vpack.c.bf16 (!%p166_p9), %v269_v12, %v257_v11  ;;  %v281_v17 = vld [vmem:[%s4801_s1 + $0x248] sm:$0xff] (!%p166_p9)  ;;  %v2292_v19 = vpack.c.bf16 (!%p166_p9), %v268_v16, %v256_v15  ;;  %v280_v21 = vld [vmem:[%s4801_s1 + $0x240] sm:$0xff] (!%p166_p9)  ;;  %s2917_s10 = scalar_lea.vmem (!%p166_p9), %s2916_s9, 1024  ;;  %p2918_p0 = scmp.lt.s32.totalorder (!%p166_p9), %s4752_s28, %s2916_s9 }
  0x14   : > { %v293_v18 = vld [vmem:[%s4801_s1 + $0x2a8] sm:$0xff] (!%p166_p9)  ;;  %v292_v22 = vld [vmem:[%s4801_s1 + $0x2a0] sm:$0xff] (!%p166_p9) }
  0x15   : > { %v2294_v20 = vpack.c.bf16 %v293_v18, %v281_v17  ;;  %v305_v23 = vld [vmem:[%s4801_s1 + $0x308] sm:$0xff]  ;;  %s192_s29 = scalar_select %p191_p10, %s3024_s19, 1  ;;  %v2296_v25 = vpack.c.bf16 %v292_v22, %v280_v21  ;;  %v304_v27 = vld [vmem:[%s4801_s1 + $0x300] sm:$0xff] }
  0x16   : > { %2289 = vmatpush1.bf16.msra.mxu0 %v2288_v13  ;;  %v317_v24 = vld [vmem:[%s4801_s1 + $0x368] sm:$0xff]  ;;  %v316_v28 = vld [vmem:[%s4801_s1 + $0x360] sm:$0xff]  ;;  %s2911_s19 = scalar_lea.vmem %s4752_s28, 512 }
  0x17   : > { %2291 = vmatprep.subr.bf16.mxu0 %v2290_v14  ;;  %v2298_v26 = vpack.c.bf16 %v317_v24, %v305_v23  ;;  %v329_v29 = vld [vmem:[%s4801_s1 + $0x3c8] sm:$0xff]  ;;  %s2192_s12 = sshll.u32 %s192_s29, 5  ;;  %v2300_v31 = vpack.c.bf16 %v316_v28, %v304_v27  ;;  %v328_v33 = vld [vmem:[%s4801_s1 + $0x3c0] sm:$0xff]  ;;  %p2912_p11 = scmp.ne.s32.totalorder %s4752_s28, %s2911_s19 }
  0x18   : > { %v341_v30 = vld [vmem:[%s4801_s1 + $0x428] sm:$0xff]  ;;  %v340_v34 = vld [vmem:[%s4801_s1 + $0x420] sm:$0xff]  ;;  %s3134_s6 = scalar_lea.vmem %s4800_s0, %s2192_s12  ;;  %p2919_p1 = scmp.lt.s32.totalorder %s2917_s10, %s2911_s19 }
  0x19   : > { %v2302_v32 = vpack.c.bf16 %v341_v30, %v329_v29  ;;  %v353_v35 = vld [vmem:[%s4801_s1 + $0x488] sm:$0xff]  ;;  %v2304_v37 = vpack.c.bf16 %v340_v34, %v328_v33  ;;  %v352_v39 = vld [vmem:[%s4801_s1 + $0x480] sm:$0xff]  ;;  %v223_v33 = vld [vmem:[%s4801_s1 + $0x78] sm:$0xff]  ;;  %p2913_p12 = pnand %p2912_p11, %p3041_p5 }
  0x1a   : > { %2293 = vmatpush1.bf16.msra.mxu0 %v2292_v19  ;;  %v365_v36 = vld [vmem:[%s4801_s1 + $0x4e8] sm:$0xff]  ;;  %v364_v40 = vld [vmem:[%s4801_s1 + $0x4e0] sm:$0xff]  ;;  %p2920_p2 = por %p2919_p1, %p2918_p0 }
  0x1b   : > { %2295 = vmatprep.subr.bf16.mxu0 %v2294_v20  ;;  %v2306_v38 = vpack.c.bf16 %v365_v36, %v353_v35  ;;  %v3143_v41 = vld [vmem:[%s3134_s6 + $0x8] sm:$0xff]  ;;  %v2308_v44 = vpack.c.bf16 %v364_v40, %v352_v39  ;;  %v376_v46 = vld [vmem:[%s4801_s1 + $0x540] sm:$0xff]  ;;  %v210_v36 = vld [vmem:[%s4801_s1 + $0x10] sm:$0xff]  ;;  %p2914_p13 = pneg %p2913_p12 }
  0x1c   : > { %v377_v42 = vld [vmem:[%s4801_s1 + $0x548] sm:$0xff]  ;;  %656 = vmatprep.mubr.f32.mxu0 %v3143_v41  ;;  %887 = vmatprep.mubr.f32.mxu1 %v3143_v41  ;;  %v388_v47 = vld [vmem:[%s4801_s1 + $0x5a0] sm:$0xff]  ;;  %v247_v39 = vld [vmem:[%s4801_s1 + $0x138] sm:$0xff] }
  0x1d   : > { %v389_v43 = vld [vmem:[%s4801_s1 + $0x5a8] sm:$0xff]  ;;  %v2312_v50 = vpack.c.bf16 %v388_v47, %v376_v46  ;;  %v400_v52 = vld [vmem:[%s4801_s1 + $0x600] sm:$0xff]  ;;  %v3283_v46 = vld [vmem:[%s3134_s6 + $0x18] sm:$0xff]  ;;  %p2921_p3 = pnand %p2920_p2, %p2914_p13 }
  0x1e   : > { %2297 = vmatpush1.bf16.msra.mxu0 %v2296_v25  ;;  %v2310_v45 = vpack.c.bf16 %v389_v43, %v377_v42  ;;  %v401_v48 = vld [vmem:[%s4801_s1 + $0x608] sm:$0xff]  ;;  %v412_v53 = vld [vmem:[%s4801_s1 + $0x660] sm:$0xff]  ;;  %v259_v47 = vld [vmem:[%s4801_s1 + $0x198] sm:$0xff] }
  0x1f   : > { %2299 = vmatprep.subr.bf16.mxu0 %v2298_v26  ;;  %v413_v49 = vld [vmem:[%s4801_s1 + $0x668] sm:$0xff]  ;;  %v2316_v56 = vpack.c.bf16 %v412_v53, %v400_v52  ;;  %v424_v58 = vld [vmem:[%s4801_s1 + $0x6c0] sm:$0xff]  ;;  %v258_v52 = vld [vmem:[%s4801_s1 + $0x190] sm:$0xff] }
  0x20   : > { %v2314_v51 = vpack.c.bf16 %v413_v49, %v401_v48  ;;  %v425_v54 = vld [vmem:[%s4801_s1 + $0x6c8] sm:$0xff]  ;;  %v436_v59 = vld [vmem:[%s4801_s1 + $0x720] sm:$0xff]  ;;  %v271_v48 = vld [vmem:[%s4801_s1 + $0x1f8] sm:$0xff] }
  0x21   : > { %v437_v55 = vld [vmem:[%s4801_s1 + $0x728] sm:$0xff]  ;;  %v2320_v62 = vpack.c.bf16 %v436_v59, %v424_v58  ;;  %v448_v0 = vld [vmem:[%s4801_s1 + $0x780] sm:$0xff]  ;;  %v270_v53 = vld [vmem:[%s4801_s1 + $0x1f0] sm:$0xff] }
  0x22   : > { %2301 = vmatpush1.bf16.msra.mxu0 %v2300_v31  ;;  %v2318_v57 = vpack.c.bf16 %v437_v55, %v425_v54  ;;  %v449_v60 = vld [vmem:[%s4801_s1 + $0x788] sm:$0xff]  ;;  %v460_v1 = vld [vmem:[%s4801_s1 + $0x7e0] sm:$0xff]  ;;  %v283_v54 = vld [vmem:[%s4801_s1 + $0x258] sm:$0xff] }
  0x23   : > { %2303 = vmatprep.subr.bf16.mxu0 %v2302_v32  ;;  %v461_v61 = vld [vmem:[%s4801_s1 + $0x7e8] sm:$0xff]  ;;  %v2324_v4 = vpack.c.bf16 %v460_v1, %v448_v0  ;;  %v472_v6 = vld [vmem:[%s4801_s1 + $0x840] sm:$0xff]  ;;  %v211_v32 = vld [vmem:[%s4801_s1 + $0x18] sm:$0xff] }
  0x24   : > { %v2322_v63 = vpack.c.bf16 %v461_v61, %v449_v60  ;;  %v473_v2 = vld [vmem:[%s4801_s1 + $0x848] sm:$0xff]  ;;  %v484_v7 = vld [vmem:[%s4801_s1 + $0x8a0] sm:$0xff]  ;;  %v2346_v35 = vpack.c.bf16 %v223_v33, %v211_v32  ;;  %v295_v55 = vld [vmem:[%s4801_s1 + $0x2b8] sm:$0xff] }
  0x25   : > { %v485_v3 = vld [vmem:[%s4801_s1 + $0x8a8] sm:$0xff]  ;;  %v2328_v10 = vpack.c.bf16 %v484_v7, %v472_v6  ;;  %v496_v12 = vld [vmem:[%s4801_s1 + $0x900] sm:$0xff]  ;;  %v282_v58 = vld [vmem:[%s4801_s1 + $0x250] sm:$0xff] }
  0x26   : > { %2305 = vmatpush1.bf16.msra.mxu0 %v2304_v37  ;;  %v2326_v5 = vpack.c.bf16 %v485_v3, %v473_v2  ;;  %v497_v8 = vld [vmem:[%s4801_s1 + $0x908] sm:$0xff]  ;;  %v508_v13 = vld [vmem:[%s4801_s1 + $0x960] sm:$0xff]  ;;  %v222_v37 = vld [vmem:[%s4801_s1 + $0x70] sm:$0xff] }
  0x27   : > { %2307 = vmatprep.subr.bf16.mxu0 %v2306_v38  ;;  %v509_v9 = vld [vmem:[%s4801_s1 + $0x968] sm:$0xff]  ;;  %v2332_v16 = vpack.c.bf16 %v508_v13, %v496_v12  ;;  %v520_v18 = vld [vmem:[%s4801_s1 + $0x9c0] sm:$0xff]  ;;  %v235_v38 = vld [vmem:[%s4801_s1 + $0xd8] sm:$0xff]  ;;  %v2348_v42 = vpack.c.bf16 %v222_v37, %v210_v36 }
  0x28   : > { %v2330_v11 = vpack.c.bf16 %v509_v9, %v497_v8  ;;  %v521_v14 = vld [vmem:[%s4801_s1 + $0x9c8] sm:$0xff]  ;;  %v532_v19 = vld [vmem:[%s4801_s1 + $0xa20] sm:$0xff]  ;;  %v2350_v43 = vpack.c.bf16 %v247_v39, %v235_v38  ;;  %v294_v59 = vld [vmem:[%s4801_s1 + $0x2b0] sm:$0xff] }
  0x29   : > { %v533_v15 = vld [vmem:[%s4801_s1 + $0xa28] sm:$0xff]  ;;  %v2336_v22 = vpack.c.bf16 %v532_v19, %v520_v18  ;;  %v544_v24 = vld [vmem:[%s4801_s1 + $0xa80] sm:$0xff]  ;;  %v307_v60 = vld [vmem:[%s4801_s1 + $0x318] sm:$0xff] }
  0x2a   : > { %2309 = vmatpush1.bf16.msra.mxu0 %v2308_v44  ;;  %v2334_v17 = vpack.c.bf16 %v533_v15, %v521_v14  ;;  %v545_v20 = vld [vmem:[%s4801_s1 + $0xa88] sm:$0xff]  ;;  %v556_v25 = vld [vmem:[%s4801_s1 + $0xae0] sm:$0xff]  ;;  %v234_v44 = vld [vmem:[%s4801_s1 + $0xd0] sm:$0xff] }
  0x2b   : > { %2311 = vmatprep.subr.bf16.mxu0 %v2310_v45  ;;  %v557_v21 = vld [vmem:[%s4801_s1 + $0xae8] sm:$0xff]  ;;  %v2340_v28 = vpack.c.bf16 %v556_v25, %v544_v24  ;;  %v568_v30 = vld [vmem:[%s4801_s1 + $0xb40] sm:$0xff]  ;;  %v246_v45 = vld [vmem:[%s4801_s1 + $0x130] sm:$0xff] }
  0x2c   : > { %v2338_v23 = vpack.c.bf16 %v557_v21, %v545_v20  ;;  %v569_v26 = vld [vmem:[%s4801_s1 + $0xb48] sm:$0xff]  ;;  %v580_v31 = vld [vmem:[%s4801_s1 + $0xba0] sm:$0xff]  ;;  %v2352_v49 = vpack.c.bf16 %v246_v45, %v234_v44  ;;  %v319_v61 = vld [vmem:[%s4801_s1 + $0x378] sm:$0xff] }
  0x2d   : > { %v581_v27 = vld [vmem:[%s4801_s1 + $0xba8] sm:$0xff]  ;;  %v2344_v34 = vpack.c.bf16 %v580_v31, %v568_v30  ;;  %v3274_v40 = vld [vmem:[%s3134_s6] sm:$0xff]  ;;  %v306_v0 = vld [vmem:[%s4801_s1 + $0x310] sm:$0xff] }
  0x2e   : > { %2313 = vmatpush1.bf16.msra.mxu0 %v2312_v50  ;;  %v2342_v29 = vpack.c.bf16 %v581_v27, %v569_v26  ;;  %v3294_v50 = vld [vmem:[%s3134_s6 + $0x10] sm:$0xff]  ;;  %v331_v2 = vld [vmem:[%s4801_s1 + $0x3d8] sm:$0xff] }
  0x2f   : > { %2315 = vmatprep.subr.bf16.mxu0 %v2314_v51  ;;  %v2354_v51 = vpack.c.bf16 %v271_v48, %v259_v47  ;;  %v318_v1 = vld [vmem:[%s4801_s1 + $0x370] sm:$0xff]  ;;  %v343_v3 = vld [vmem:[%s4801_s1 + $0x438] sm:$0xff] }
  0x30   : > { %v330_v6 = vld [vmem:[%s4801_s1 + $0x3d0] sm:$0xff]  ;;  %v355_v8 = vld [vmem:[%s4801_s1 + $0x498] sm:$0xff] }
  0x31   : > { %v342_v7 = vld [vmem:[%s4801_s1 + $0x430] sm:$0xff]  ;;  %v367_v9 = vld [vmem:[%s4801_s1 + $0x4f8] sm:$0xff] }
  0x32   : > { %2317 = vmatpush1.bf16.msra.mxu0 %v2316_v56  ;;  %v2356_v56 = vpack.c.bf16 %v270_v53, %v258_v52  ;;  %v354_v12 = vld [vmem:[%s4801_s1 + $0x490] sm:$0xff]  ;;  %v379_v14 = vld [vmem:[%s4801_s1 + $0x558] sm:$0xff] }
  0x33   : > { %2319 = vmatprep.subr.bf16.mxu0 %v2318_v57  ;;  %v2358_v57 = vpack.c.bf16 %v295_v55, %v283_v54  ;;  %v366_v13 = vld [vmem:[%s4801_s1 + $0x4f0] sm:$0xff]  ;;  %v391_v15 = vld [vmem:[%s4801_s1 + $0x5b8] sm:$0xff] }
  0x34   : > { %v378_v18 = vld [vmem:[%s4801_s1 + $0x550] sm:$0xff]  ;;  %v403_v20 = vld [vmem:[%s4801_s1 + $0x618] sm:$0xff] }
  0x35   : > { %v390_v19 = vld [vmem:[%s4801_s1 + $0x5b0] sm:$0xff]  ;;  %v415_v21 = vld [vmem:[%s4801_s1 + $0x678] sm:$0xff] }
  0x36   : > { %2321 = vmatpush1.bf16.msra.mxu0 %v2320_v62  ;;  %v2360_v62 = vpack.c.bf16 %v294_v59, %v282_v58  ;;  %v402_v24 = vld [vmem:[%s4801_s1 + $0x610] sm:$0xff]  ;;  %v427_v26 = vld [vmem:[%s4801_s1 + $0x6d8] sm:$0xff] }
  0x37   : > { %2323 = vmatprep.subr.bf16.mxu0 %v2322_v63  ;;  %v2362_v63 = vpack.c.bf16 %v319_v61, %v307_v60  ;;  %v414_v25 = vld [vmem:[%s4801_s1 + $0x670] sm:$0xff]  ;;  %v439_v27 = vld [vmem:[%s4801_s1 + $0x738] sm:$0xff] }
  0x38   : > { %v426_v30 = vld [vmem:[%s4801_s1 + $0x6d0] sm:$0xff]  ;;  %v451_v32 = vld [vmem:[%s4801_s1 + $0x798] sm:$0xff] }
  0x39   : > { %v438_v31 = vld [vmem:[%s4801_s1 + $0x730] sm:$0xff]  ;;  %v463_v33 = vld [vmem:[%s4801_s1 + $0x7f8] sm:$0xff] }
  0x3a   : > { %2325 = vmatpush1.bf16.msra.mxu0 %v2324_v4  ;;  %v2364_v4 = vpack.c.bf16 %v318_v1, %v306_v0  ;;  %v450_v36 = vld [vmem:[%s4801_s1 + $0x790] sm:$0xff]  ;;  %v475_v38 = vld [vmem:[%s4801_s1 + $0x858] sm:$0xff] }
  0x3b   : > { %2327 = vmatprep.subr.bf16.mxu0 %v2326_v5  ;;  %v2366_v5 = vpack.c.bf16 %v343_v3, %v331_v2  ;;  %v462_v37 = vld [vmem:[%s4801_s1 + $0x7f0] sm:$0xff]  ;;  %v487_v39 = vld [vmem:[%s4801_s1 + $0x8b8] sm:$0xff] }
  0x3c   : > { %v474_v44 = vld [vmem:[%s4801_s1 + $0x850] sm:$0xff]  ;;  %v499_v47 = vld [vmem:[%s4801_s1 + $0x918] sm:$0xff] }
  0x3d   : > { %v486_v45 = vld [vmem:[%s4801_s1 + $0x8b0] sm:$0xff]  ;;  %v511_v48 = vld [vmem:[%s4801_s1 + $0x978] sm:$0xff] }
  0x3e   : > { %2329 = vmatpush1.bf16.msra.mxu0 %v2328_v10  ;;  %v2368_v10 = vpack.c.bf16 %v342_v7, %v330_v6  ;;  %v498_v52 = vld [vmem:[%s4801_s1 + $0x910] sm:$0xff]  ;;  %v523_v54 = vld [vmem:[%s4801_s1 + $0x9d8] sm:$0xff] }
  0x3f   : > { %2331 = vmatprep.subr.bf16.mxu0 %v2330_v11  ;;  %v2370_v11 = vpack.c.bf16 %v367_v9, %v355_v8  ;;  %v510_v53 = vld [vmem:[%s4801_s1 + $0x970] sm:$0xff]  ;;  %v535_v55 = vld [vmem:[%s4801_s1 + $0xa38] sm:$0xff]  ;;  %v213_v8 = vld [vmem:[%s4801_s1 + $0x28] sm:$0xff] }
  0x40   : > { %v522_v58 = vld [vmem:[%s4801_s1 + $0x9d0] sm:$0xff]  ;;  %v547_v60 = vld [vmem:[%s4801_s1 + $0xa98] sm:$0xff]  ;;  %v225_v9 = vld [vmem:[%s4801_s1 + $0x88] sm:$0xff] }
  0x41   : > { %v534_v59 = vld [vmem:[%s4801_s1 + $0xa30] sm:$0xff]  ;;  %v559_v61 = vld [vmem:[%s4801_s1 + $0xaf8] sm:$0xff] }
  0x42   : > { %2333 = vmatpush1.bf16.msra.mxu0 %v2332_v16  ;;  %v2372_v16 = vpack.c.bf16 %v366_v13, %v354_v12  ;;  %v546_v0 = vld [vmem:[%s4801_s1 + $0xa90] sm:$0xff]  ;;  %v571_v2 = vld [vmem:[%s4801_s1 + $0xb58] sm:$0xff]  ;;  %v212_v12 = vld [vmem:[%s4801_s1 + $0x20] sm:$0xff] }
  0x43   : > { %2335 = vmatprep.subr.bf16.mxu0 %v2334_v17  ;;  %v2374_v17 = vpack.c.bf16 %v391_v15, %v379_v14  ;;  %v558_v1 = vld [vmem:[%s4801_s1 + $0xaf0] sm:$0xff]  ;;  %v583_v3 = vld [vmem:[%s4801_s1 + $0xbb8] sm:$0xff]  ;;  %v224_v13 = vld [vmem:[%s4801_s1 + $0x80] sm:$0xff] }
  0x44   : > { %v570_v6 = vld [vmem:[%s4801_s1 + $0xb50] sm:$0xff]  ;;  %v237_v14 = vld [vmem:[%s4801_s1 + $0xe8] sm:$0xff] }
  0x45   : > { %v582_v7 = vld [vmem:[%s4801_s1 + $0xbb0] sm:$0xff]  ;;  %v249_v15 = vld [vmem:[%s4801_s1 + $0x148] sm:$0xff] }
  0x46   : > { %2337 = vmatpush1.bf16.msra.mxu0 %v2336_v22  ;;  %v2376_v22 = vpack.c.bf16 %v390_v19, %v378_v18  ;;  %v236_v18 = vld [vmem:[%s4801_s1 + $0xe0] sm:$0xff] }
  0x47   : > { %2339 = vmatprep.subr.bf16.mxu0 %v2338_v23  ;;  %v2378_v23 = vpack.c.bf16 %v415_v21, %v403_v20  ;;  %v248_v19 = vld [vmem:[%s4801_s1 + $0x140] sm:$0xff]  ;;  %v261_v20 = vld [vmem:[%s4801_s1 + $0x1a8] sm:$0xff] }
  0x48   : > { %v273_v21 = vld [vmem:[%s4801_s1 + $0x208] sm:$0xff] }
  0x4a   : > { %2341 = vmatpush1.bf16.msra.mxu0 %v2340_v28  ;;  %v2380_v28 = vpack.c.bf16 %v414_v25, %v402_v24  ;;  %v260_v24 = vld [vmem:[%s4801_s1 + $0x1a0] sm:$0xff] }
  0x4b   : > { %2343 = vmatprep.subr.bf16.mxu0 %v2342_v29  ;;  %v2382_v29 = vpack.c.bf16 %v439_v27, %v427_v26  ;;  %v272_v25 = vld [vmem:[%s4801_s1 + $0x200] sm:$0xff]  ;;  %v285_v26 = vld [vmem:[%s4801_s1 + $0x268] sm:$0xff] }
  0x4c   : > { %v297_v27 = vld [vmem:[%s4801_s1 + $0x2c8] sm:$0xff] }
  0x4e   : > { %2345 = vmatpush1.bf16.msra.mxu0 %v2344_v34  ;;  %v2384_v34 = vpack.c.bf16 %v438_v31, %v426_v30  ;;  %v284_v30 = vld [vmem:[%s4801_s1 + $0x260] sm:$0xff] }
  0x4f   : > { %2347 = vmatprep.subr.bf16.mxu0 %v2346_v35  ;;  %v2386_v35 = vpack.c.bf16 %v463_v33, %v451_v32  ;;  %v296_v31 = vld [vmem:[%s4801_s1 + $0x2c0] sm:$0xff]  ;;  %v309_v32 = vld [vmem:[%s4801_s1 + $0x328] sm:$0xff] }
  0x50   : > { %v321_v33 = vld [vmem:[%s4801_s1 + $0x388] sm:$0xff] }
  0x51   : > { %657 = vmatmul.mubr.f32.vlgmr.msra.gmra.mrb[0].mxu0 %v3274_v40 }
  0x52   : > { %2349 = vmatpush1.bf16.msra.mxu0 %v2348_v42  ;;  %662 = vmatprep.mubr.f32.mxu0 %v3283_v46  ;;  %v2388_v42 = vpack.c.bf16 %v462_v37, %v450_v36  ;;  %v308_v36 = vld [vmem:[%s4801_s1 + $0x320] sm:$0xff] }
  0x53   : > { %2351 = vmatprep.subr.bf16.mxu0 %v2350_v43  ;;  %v2390_v43 = vpack.c.bf16 %v487_v39, %v475_v38  ;;  %v320_v37 = vld [vmem:[%s4801_s1 + $0x380] sm:$0xff]  ;;  %v333_v38 = vld [vmem:[%s4801_s1 + $0x3e8] sm:$0xff] }
  0x54   : > { %v345_v39 = vld [vmem:[%s4801_s1 + $0x448] sm:$0xff] }
  0x55   : > { %663 = vmatmul.mubr.f32.gmra.mrb[2].mxu0 %v3294_v50 }
  0x56   : > { %2353 = vmatpush1.bf16.msra.mxu0 %v2352_v49  ;;  %733 = vmatprep.mubr.f32.mxu0 %v3143_v41  ;;  %v2392_v49 = vpack.c.bf16 %v486_v45, %v474_v44  ;;  %v332_v44 = vld [vmem:[%s4801_s1 + $0x3e0] sm:$0xff] }
  0x57   : > { %2355 = vmatprep.subr.bf16.mxu0 %v2354_v51  ;;  %v2394_v51 = vpack.c.bf16 %v511_v48, %v499_v47  ;;  %v344_v45 = vld [vmem:[%s4801_s1 + $0x440] sm:$0xff]  ;;  %v357_v47 = vld [vmem:[%s4801_s1 + $0x4a8] sm:$0xff] }
  0x58   : > { %v369_v48 = vld [vmem:[%s4801_s1 + $0x508] sm:$0xff] }
  0x5a   : > { %2357 = vmatpush1.bf16.msra.mxu0 %v2356_v56  ;;  %v2396_v56 = vpack.c.bf16 %v510_v53, %v498_v52  ;;  %v356_v52 = vld [vmem:[%s4801_s1 + $0x4a0] sm:$0xff] }
  0x5b   : > { %2359 = vmatprep.subr.bf16.mxu0 %v2358_v57  ;;  %v2398_v57 = vpack.c.bf16 %v535_v55, %v523_v54  ;;  %v368_v53 = vld [vmem:[%s4801_s1 + $0x500] sm:$0xff]  ;;  %v381_v54 = vld [vmem:[%s4801_s1 + $0x568] sm:$0xff] }
  0x5c   : > { %v393_v55 = vld [vmem:[%s4801_s1 + $0x5c8] sm:$0xff] }
  0x5e   : > { %2361 = vmatpush1.bf16.msra.mxu0 %v2360_v62  ;;  %v2400_v62 = vpack.c.bf16 %v534_v59, %v522_v58  ;;  %v380_v58 = vld [vmem:[%s4801_s1 + $0x560] sm:$0xff] }
  0x5f   : > { %2363 = vmatprep.subr.bf16.mxu0 %v2362_v63  ;;  %v2402_v63 = vpack.c.bf16 %v559_v61, %v547_v60  ;;  %v392_v59 = vld [vmem:[%s4801_s1 + $0x5c0] sm:$0xff]  ;;  %v405_v60 = vld [vmem:[%s4801_s1 + $0x628] sm:$0xff] }
  0x60   : > { %v417_v61 = vld [vmem:[%s4801_s1 + $0x688] sm:$0xff] }
  0x62   : > { %2365 = vmatpush1.bf16.msra.mxu0 %v2364_v4  ;;  %v2404_v4 = vpack.c.bf16 %v558_v1, %v546_v0  ;;  %v404_v0 = vld [vmem:[%s4801_s1 + $0x620] sm:$0xff] }
  0x63   : > { %2367 = vmatprep.subr.bf16.mxu0 %v2366_v5  ;;  %v2406_v5 = vpack.c.bf16 %v583_v3, %v571_v2  ;;  %v416_v1 = vld [vmem:[%s4801_s1 + $0x680] sm:$0xff]  ;;  %v429_v2 = vld [vmem:[%s4801_s1 + $0x6e8] sm:$0xff] }
  0x64   : > { %v441_v3 = vld [vmem:[%s4801_s1 + $0x748] sm:$0xff] }
  0x66   : > { %2369 = vmatpush1.bf16.msra.mxu0 %v2368_v10  ;;  %v2408_v10 = vpack.c.bf16 %v582_v7, %v570_v6  ;;  %v428_v6 = vld [vmem:[%s4801_s1 + $0x6e0] sm:$0xff] }
  0x67   : > { %2371 = vmatprep.subr.bf16.mxu0 %v2370_v11  ;;  %v2410_v11 = vpack.c.bf16 %v225_v9, %v213_v8  ;;  %v440_v7 = vld [vmem:[%s4801_s1 + $0x740] sm:$0xff]  ;;  %v453_v8 = vld [vmem:[%s4801_s1 + $0x7a8] sm:$0xff] }
  0x68   : > { %v465_v9 = vld [vmem:[%s4801_s1 + $0x808] sm:$0xff] }
  0x6a   : > { %2373 = vmatpush1.bf16.msra.mxu0 %v2372_v16  ;;  %v2412_v16 = vpack.c.bf16 %v224_v13, %v212_v12  ;;  %v452_v12 = vld [vmem:[%s4801_s1 + $0x7a0] sm:$0xff] }
  0x6b   : > { %2375 = vmatprep.subr.bf16.mxu0 %v2374_v17  ;;  %v2414_v17 = vpack.c.bf16 %v249_v15, %v237_v14  ;;  %v464_v13 = vld [vmem:[%s4801_s1 + $0x800] sm:$0xff]  ;;  %v477_v14 = vld [vmem:[%s4801_s1 + $0x868] sm:$0xff] }
  0x6c   : > { %v489_v15 = vld [vmem:[%s4801_s1 + $0x8c8] sm:$0xff] }
  0x6e   : > { %2377 = vmatpush1.bf16.msra.mxu0 %v2376_v22  ;;  %v2416_v22 = vpack.c.bf16 %v248_v19, %v236_v18  ;;  %v476_v18 = vld [vmem:[%s4801_s1 + $0x860] sm:$0xff] }
  0x6f   : > { %2379 = vmatprep.subr.bf16.mxu0 %v2378_v23  ;;  %v2418_v23 = vpack.c.bf16 %v273_v21, %v261_v20  ;;  %v488_v19 = vld [vmem:[%s4801_s1 + $0x8c0] sm:$0xff]  ;;  %v501_v20 = vld [vmem:[%s4801_s1 + $0x928] sm:$0xff] }
  0x70   : > { %v513_v21 = vld [vmem:[%s4801_s1 + $0x988] sm:$0xff] }
  0x72   : > { %2381 = vmatpush1.bf16.msra.mxu0 %v2380_v28  ;;  %v2420_v28 = vpack.c.bf16 %v272_v25, %v260_v24  ;;  %v500_v24 = vld [vmem:[%s4801_s1 + $0x920] sm:$0xff] }
  0x73   : > { %2383 = vmatprep.subr.bf16.mxu0 %v2382_v29  ;;  %v2422_v29 = vpack.c.bf16 %v297_v27, %v285_v26  ;;  %v512_v25 = vld [vmem:[%s4801_s1 + $0x980] sm:$0xff]  ;;  %v525_v26 = vld [vmem:[%s4801_s1 + $0x9e8] sm:$0xff] }
  0x74   : > { %v537_v27 = vld [vmem:[%s4801_s1 + $0xa48] sm:$0xff] }
  0x76   : > { %2385 = vmatpush1.bf16.msra.mxu0 %v2384_v34  ;;  %v2424_v34 = vpack.c.bf16 %v296_v31, %v284_v30  ;;  %v524_v30 = vld [vmem:[%s4801_s1 + $0x9e0] sm:$0xff] }
  0x77   : > { %2387 = vmatprep.subr.bf16.mxu0 %v2386_v35  ;;  %v2426_v35 = vpack.c.bf16 %v321_v33, %v309_v32  ;;  %v536_v31 = vld [vmem:[%s4801_s1 + $0xa40] sm:$0xff]  ;;  %v549_v32 = vld [vmem:[%s4801_s1 + $0xaa8] sm:$0xff] }
  0x78   : > { %v561_v33 = vld [vmem:[%s4801_s1 + $0xb08] sm:$0xff] }
  0x7a   : > { %2389 = vmatpush1.bf16.msra.mxu0 %v2388_v42  ;;  %v2428_v42 = vpack.c.bf16 %v320_v37, %v308_v36  ;;  %v548_v36 = vld [vmem:[%s4801_s1 + $0xaa0] sm:$0xff] }
  0x7b   : > { %2391 = vmatprep.subr.bf16.mxu0 %v2390_v43  ;;  %v2430_v43 = vpack.c.bf16 %v345_v39, %v333_v38  ;;  %v560_v37 = vld [vmem:[%s4801_s1 + $0xb00] sm:$0xff]  ;;  %v573_v38 = vld [vmem:[%s4801_s1 + $0xb68] sm:$0xff] }
  0x7c   : > { %v585_v39 = vld [vmem:[%s4801_s1 + $0xbc8] sm:$0xff] }
  0x7e   : > { %2393 = vmatpush1.bf16.msra.mxu0 %v2392_v49  ;;  %v2432_v49 = vpack.c.bf16 %v344_v45, %v332_v44  ;;  %v572_v44 = vld [vmem:[%s4801_s1 + $0xb60] sm:$0xff] }
  0x7f   : > { %2395 = vmatprep.subr.bf16.mxu0 %v2394_v51  ;;  %v2434_v51 = vpack.c.bf16 %v369_v48, %v357_v47  ;;  %v584_v45 = vld [vmem:[%s4801_s1 + $0xbc0] sm:$0xff]  ;;  %v217_v47 = vld [vmem:[%s4801_s1 + $0x48] sm:$0xff] }
  0x80   : > { %v229_v48 = vld [vmem:[%s4801_s1 + $0xa8] sm:$0xff] }
  0x82   : > { %2397 = vmatpush1.bf16.msra.mxu0 %v2396_v56  ;;  %v2436_v56 = vpack.c.bf16 %v368_v53, %v356_v52  ;;  %v216_v52 = vld [vmem:[%s4801_s1 + $0x40] sm:$0xff] }
  0x83   : > { %2399 = vmatprep.subr.bf16.mxu0 %v2398_v57  ;;  %v2438_v57 = vpack.c.bf16 %v393_v55, %v381_v54  ;;  %v228_v53 = vld [vmem:[%s4801_s1 + $0xa0] sm:$0xff]  ;;  %v241_v54 = vld [vmem:[%s4801_s1 + $0x108] sm:$0xff] }
  0x84   : > { %v253_v55 = vld [vmem:[%s4801_s1 + $0x168] sm:$0xff] }
  0x86   : > { %2401 = vmatpush1.bf16.msra.mxu0 %v2400_v62  ;;  %v2440_v62 = vpack.c.bf16 %v392_v59, %v380_v58  ;;  %v240_v58 = vld [vmem:[%s4801_s1 + $0x100] sm:$0xff] }
  0x87   : > { %2403 = vmatprep.subr.bf16.mxu0 %v2402_v63  ;;  %v2442_v63 = vpack.c.bf16 %v417_v61, %v405_v60  ;;  %v252_v59 = vld [vmem:[%s4801_s1 + $0x160] sm:$0xff]  ;;  %v265_v60 = vld [vmem:[%s4801_s1 + $0x1c8] sm:$0xff] }
  0x88   : > { %v277_v61 = vld [vmem:[%s4801_s1 + $0x228] sm:$0xff] }
  0x8a   : > { %2405 = vmatpush1.bf16.msra.mxu0 %v2404_v4  ;;  %v2444_v4 = vpack.c.bf16 %v416_v1, %v404_v0  ;;  %v264_v0 = vld [vmem:[%s4801_s1 + $0x1c0] sm:$0xff] }
  0x8b   : > { %2407 = vmatprep.subr.bf16.mxu0 %v2406_v5  ;;  %v2446_v5 = vpack.c.bf16 %v441_v3, %v429_v2  ;;  %v276_v1 = vld [vmem:[%s4801_s1 + $0x220] sm:$0xff]  ;;  %v289_v2 = vld [vmem:[%s4801_s1 + $0x288] sm:$0xff] }
  0x8c   : > { %v301_v3 = vld [vmem:[%s4801_s1 + $0x2e8] sm:$0xff] }
  0x8e   : > { %2409 = vmatpush1.bf16.msra.mxu0 %v2408_v10  ;;  %v2448_v10 = vpack.c.bf16 %v440_v7, %v428_v6  ;;  %v288_v6 = vld [vmem:[%s4801_s1 + $0x280] sm:$0xff] }
  0x8f   : > { %2411 = vmatprep.subr.bf16.mxu0 %v2410_v11  ;;  %v2450_v11 = vpack.c.bf16 %v465_v9, %v453_v8  ;;  %v300_v7 = vld [vmem:[%s4801_s1 + $0x2e0] sm:$0xff]  ;;  %v313_v8 = vld [vmem:[%s4801_s1 + $0x348] sm:$0xff] }
  0x90   : > { %v325_v9 = vld [vmem:[%s4801_s1 + $0x3a8] sm:$0xff] }
  0x91   : > { %734 = vmatmul.mubr.f32.vlgmr.msra.gmra.mrb[4].mxu0 %v3274_v40 }
  0x92   : > { %2413 = vmatpush1.bf16.msra.mxu0 %v2412_v16  ;;  %739 = vmatprep.mubr.f32.mxu0 %v3283_v46  ;;  %v2452_v16 = vpack.c.bf16 %v464_v13, %v452_v12  ;;  %v324_v12 = vld [vmem:[%s4801_s1 + $0x3a0] sm:$0xff]  ;;  %v337_v13 = vld [vmem:[%s4801_s1 + $0x408] sm:$0xff] }
  0x93   : > { %2415 = vmatprep.subr.bf16.mxu0 %v2414_v17  ;;  %v2454_v17 = vpack.c.bf16 %v489_v15, %v477_v14  ;;  %v349_v14 = vld [vmem:[%s4801_s1 + $0x468] sm:$0xff] }
  0x95   : > { %740 = vmatmul.mubr.f32.gmra.mrb[6].mxu0 %v3294_v50 }
  0x96   : > { %2417 = vmatpush1.bf16.msra.mxu0 %v2416_v22  ;;  %810 = vmatprep.mubr.f32.mxu0 %v3143_v41  ;;  %v2456_v22 = vpack.c.bf16 %v488_v19, %v476_v18  ;;  %v348_v18 = vld [vmem:[%s4801_s1 + $0x460] sm:$0xff]  ;;  %v361_v19 = vld [vmem:[%s4801_s1 + $0x4c8] sm:$0xff] }
  0x97   : > { %2419 = vmatprep.subr.bf16.mxu0 %v2418_v23  ;;  %v2458_v23 = vpack.c.bf16 %v513_v21, %v501_v20  ;;  %v373_v20 = vld [vmem:[%s4801_s1 + $0x528] sm:$0xff] }
  0x9a   : > { %2421 = vmatpush1.bf16.msra.mxu0 %v2420_v28  ;;  %v2460_v28 = vpack.c.bf16 %v512_v25, %v500_v24  ;;  %v372_v24 = vld [vmem:[%s4801_s1 + $0x520] sm:$0xff]  ;;  %v385_v25 = vld [vmem:[%s4801_s1 + $0x588] sm:$0xff] }
  0x9b   : > { %2423 = vmatprep.subr.bf16.mxu0 %v2422_v29  ;;  %v2462_v29 = vpack.c.bf16 %v537_v27, %v525_v26  ;;  %v397_v26 = vld [vmem:[%s4801_s1 + $0x5e8] sm:$0xff] }
  0x9e   : > { %2425 = vmatpush1.bf16.msra.mxu0 %v2424_v34  ;;  %v2464_v34 = vpack.c.bf16 %v536_v31, %v524_v30  ;;  %v396_v30 = vld [vmem:[%s4801_s1 + $0x5e0] sm:$0xff]  ;;  %v409_v31 = vld [vmem:[%s4801_s1 + $0x648] sm:$0xff] }
  0x9f   : > { %2427 = vmatprep.subr.bf16.mxu0 %v2426_v35  ;;  %v2466_v35 = vpack.c.bf16 %v561_v33, %v549_v32  ;;  %v421_v32 = vld [vmem:[%s4801_s1 + $0x6a8] sm:$0xff] }
  0xa2   : > { %2429 = vmatpush1.bf16.msra.mxu0 %v2428_v42  ;;  %v2468_v42 = vpack.c.bf16 %v560_v37, %v548_v36  ;;  %v420_v36 = vld [vmem:[%s4801_s1 + $0x6a0] sm:$0xff]  ;;  %v433_v37 = vld [vmem:[%s4801_s1 + $0x708] sm:$0xff] }
  0xa3   : > { %2431 = vmatprep.subr.bf16.mxu0 %v2430_v43  ;;  %v2470_v43 = vpack.c.bf16 %v585_v39, %v573_v38  ;;  %v445_v38 = vld [vmem:[%s4801_s1 + $0x768] sm:$0xff] }
  0xa6   : > { %2433 = vmatpush1.bf16.msra.mxu0 %v2432_v49  ;;  %v2472_v49 = vpack.c.bf16 %v584_v45, %v572_v44  ;;  %v444_v44 = vld [vmem:[%s4801_s1 + $0x760] sm:$0xff]  ;;  %v457_v45 = vld [vmem:[%s4801_s1 + $0x7c8] sm:$0xff] }
  0xa7   : > { %2435 = vmatprep.subr.bf16.mxu0 %v2434_v51  ;;  %v2538_v51 = vpack.c.bf16 %v229_v48, %v217_v47  ;;  %v469_v47 = vld [vmem:[%s4801_s1 + $0x828] sm:$0xff] }
  0xaa   : > { %2437 = vmatpush1.bf16.msra.mxu0 %v2436_v56  ;;  %v2540_v56 = vpack.c.bf16 %v228_v53, %v216_v52  ;;  %v468_v52 = vld [vmem:[%s4801_s1 + $0x820] sm:$0xff]  ;;  %v481_v53 = vld [vmem:[%s4801_s1 + $0x888] sm:$0xff] }
  0xab   : > { %2439 = vmatprep.subr.bf16.mxu0 %v2438_v57  ;;  %v2542_v57 = vpack.c.bf16 %v253_v55, %v241_v54  ;;  %v493_v54 = vld [vmem:[%s4801_s1 + $0x8e8] sm:$0xff] }
  0xae   : > { %2441 = vmatpush1.bf16.msra.mxu0 %v2440_v62  ;;  %v2544_v62 = vpack.c.bf16 %v252_v59, %v240_v58  ;;  %v492_v58 = vld [vmem:[%s4801_s1 + $0x8e0] sm:$0xff]  ;;  %v505_v59 = vld [vmem:[%s4801_s1 + $0x948] sm:$0xff] }
  0xaf   : > { %2443 = vmatprep.subr.bf16.mxu0 %v2442_v63  ;;  %v2546_v63 = vpack.c.bf16 %v277_v61, %v265_v60  ;;  %v517_v60 = vld [vmem:[%s4801_s1 + $0x9a8] sm:$0xff] }
  0xb2   : > { %2445 = vmatpush1.bf16.msra.mxu0 %v2444_v4  ;;  %v2548_v4 = vpack.c.bf16 %v276_v1, %v264_v0  ;;  %v516_v0 = vld [vmem:[%s4801_s1 + $0x9a0] sm:$0xff]  ;;  %v529_v1 = vld [vmem:[%s4801_s1 + $0xa08] sm:$0xff] }
  0xb3   : > { %2447 = vmatprep.subr.bf16.mxu0 %v2446_v5  ;;  %v2550_v5 = vpack.c.bf16 %v301_v3, %v289_v2  ;;  %v541_v2 = vld [vmem:[%s4801_s1 + $0xa68] sm:$0xff] }
  0xb6   : > { %2449 = vmatpush1.bf16.msra.mxu0 %v2448_v10  ;;  %v2554_v10 = vpack.c.bf16 %v325_v9, %v313_v8  ;;  %v565_v8 = vld [vmem:[%s4801_s1 + $0xb28] sm:$0xff] }
  0xb7   : > { %2451 = vmatprep.subr.bf16.mxu0 %v2450_v11  ;;  %v312_v11 = vld [vmem:[%s4801_s1 + $0x340] sm:$0xff] }
  0xb8   : > { %v2556_v15 = vpack.c.bf16 %v324_v12, %v312_v11  ;;  %v564_v11 = vld [vmem:[%s4801_s1 + $0xb20] sm:$0xff]  ;;  %v577_v12 = vld [vmem:[%s4801_s1 + $0xb88] sm:$0xff] }
  0xba   : > { %2453 = vmatpush1.bf16.msra.mxu0 %v2452_v16  ;;  %v2558_v16 = vpack.c.bf16 %v349_v14, %v337_v13  ;;  %v589_v13 = vld [vmem:[%s4801_s1 + $0xbe8] sm:$0xff] }
  0xbb   : > { %2455 = vmatprep.subr.bf16.mxu0 %v2454_v17  ;;  %v336_v17 = vld [vmem:[%s4801_s1 + $0x400] sm:$0xff] }
  0xbc   : > { %v2560_v21 = vpack.c.bf16 %v348_v18, %v336_v17  ;;  %v588_v17 = vld [vmem:[%s4801_s1 + $0xbe0] sm:$0xff] }
  0xbe   : > { %2457 = vmatpush1.bf16.msra.mxu0 %v2456_v22  ;;  %v2562_v22 = vpack.c.bf16 %v373_v20, %v361_v19 }
  0xbf   : > { %2459 = vmatprep.subr.bf16.mxu0 %v2458_v23  ;;  %v360_v23 = vld [vmem:[%s4801_s1 + $0x4c0] sm:$0xff] }
  0xc0   : > { %v2564_v27 = vpack.c.bf16 %v372_v24, %v360_v23  ;;  %v215_v23 = vld [vmem:[%s4801_s1 + $0x38] sm:$0xff]  ;;  %v226_v24 = vld [vmem:[%s4801_s1 + $0x90] sm:$0xff] }
  0xc2   : > { %2461 = vmatpush1.bf16.msra.mxu0 %v2460_v28  ;;  %v2566_v28 = vpack.c.bf16 %v397_v26, %v385_v25  ;;  %v239_v25 = vld [vmem:[%s4801_s1 + $0xf8] sm:$0xff] }
  0xc3   : > { %2463 = vmatprep.subr.bf16.mxu0 %v2462_v29  ;;  %v384_v29 = vld [vmem:[%s4801_s1 + $0x580] sm:$0xff]  ;;  %v251_v26 = vld [vmem:[%s4801_s1 + $0x158] sm:$0xff] }
  0xc4   : > { %v2568_v33 = vpack.c.bf16 %v396_v30, %v384_v29  ;;  %v238_v29 = vld [vmem:[%s4801_s1 + $0xf0] sm:$0xff] }
  0xc5   : > { %v250_v30 = vld [vmem:[%s4801_s1 + $0x150] sm:$0xff] }
  0xc6   : > { %2465 = vmatpush1.bf16.msra.mxu0 %v2464_v34  ;;  %v2570_v34 = vpack.c.bf16 %v421_v32, %v409_v31  ;;  %v263_v31 = vld [vmem:[%s4801_s1 + $0x1b8] sm:$0xff] }
  0xc7   : > { %2467 = vmatprep.subr.bf16.mxu0 %v2466_v35  ;;  %v408_v35 = vld [vmem:[%s4801_s1 + $0x640] sm:$0xff]  ;;  %v275_v32 = vld [vmem:[%s4801_s1 + $0x218] sm:$0xff] }
  0xc8   : > { %v2572_v39 = vpack.c.bf16 %v420_v36, %v408_v35  ;;  %v262_v35 = vld [vmem:[%s4801_s1 + $0x1b0] sm:$0xff] }
  0xc9   : > { %v274_v36 = vld [vmem:[%s4801_s1 + $0x210] sm:$0xff] }
  0xca   : > { %2469 = vmatpush1.bf16.msra.mxu0 %v2468_v42  ;;  %v2574_v42 = vpack.c.bf16 %v445_v38, %v433_v37  ;;  %v287_v37 = vld [vmem:[%s4801_s1 + $0x278] sm:$0xff] }
  0xcb   : > { %2471 = vmatprep.subr.bf16.mxu0 %v2470_v43  ;;  %v432_v43 = vld [vmem:[%s4801_s1 + $0x700] sm:$0xff]  ;;  %v299_v38 = vld [vmem:[%s4801_s1 + $0x2d8] sm:$0xff] }
  0xcc   : > { %v2576_v48 = vpack.c.bf16 %v444_v44, %v432_v43  ;;  %v286_v43 = vld [vmem:[%s4801_s1 + $0x270] sm:$0xff] }
  0xcd   : > { %v298_v44 = vld [vmem:[%s4801_s1 + $0x2d0] sm:$0xff] }
  0xce   : > { %2473 = vmatpush1.bf16.msra.mxu0 %v2472_v49  ;;  %v2578_v49 = vpack.c.bf16 %v469_v47, %v457_v45  ;;  %v311_v45 = vld [vmem:[%s4801_s1 + $0x338] sm:$0xff] }
  0xcf   : > { %2539 = vmatprep.subr.bf16.mxu0 %v2538_v51  ;;  %v456_v51 = vld [vmem:[%s4801_s1 + $0x7c0] sm:$0xff]  ;;  %v323_v47 = vld [vmem:[%s4801_s1 + $0x398] sm:$0xff] }
  0xd0   : > { %v2580_v55 = vpack.c.bf16 %v468_v52, %v456_v51  ;;  %v310_v51 = vld [vmem:[%s4801_s1 + $0x330] sm:$0xff] }
  0xd1   : > { %811 = vmatmul.mubr.f32.vlgmr.msra.gmra.mrb[8].mxu0 %v3274_v40  ;;  %v322_v52 = vld [vmem:[%s4801_s1 + $0x390] sm:$0xff] }
  0xd2   : > { %816 = vmatprep.mubr.f32.mxu0 %v3283_v46  ;;  %2541 = vmatpush1.bf16.msra.mxu0 %v2540_v56  ;;  %v2582_v56 = vpack.c.bf16 %v493_v54, %v481_v53  ;;  %v335_v53 = vld [vmem:[%s4801_s1 + $0x3f8] sm:$0xff] }
  0xd3   : > { %2543 = vmatprep.subr.bf16.mxu0 %v2542_v57  ;;  %v480_v57 = vld [vmem:[%s4801_s1 + $0x880] sm:$0xff]  ;;  %v347_v54 = vld [vmem:[%s4801_s1 + $0x458] sm:$0xff] }
  0xd4   : > { %v2584_v61 = vpack.c.bf16 %v492_v58, %v480_v57  ;;  %v334_v57 = vld [vmem:[%s4801_s1 + $0x3f0] sm:$0xff] }
  0xd5   : > { %817 = vmatmul.mubr.f32.gmra.mrb[10].mxu0 %v3294_v50  ;;  %v346_v58 = vld [vmem:[%s4801_s1 + $0x450] sm:$0xff] }
  0xd6   : > { %2545 = vmatpush1.bf16.msra.mxu0 %v2544_v62  ;;  %964 = vmatprep.mubr.f32.mxu0 %v3143_v41  ;;  %v2552_v41 = vpack.c.bf16 %v300_v7, %v288_v6  ;;  %v2586_v62 = vpack.c.bf16 %v517_v60, %v505_v59  ;;  %v540_v6 = vld [vmem:[%s4801_s1 + $0xa60] sm:$0xff]  ;;  %v553_v7 = vld [vmem:[%s4801_s1 + $0xac8] sm:$0xff]  ;;  %v359_v59 = vld [vmem:[%s4801_s1 + $0x4b8] sm:$0xff] }
  0xd7   : > { %2547 = vmatprep.subr.bf16.mxu0 %v2546_v63  ;;  %v504_v63 = vld [vmem:[%s4801_s1 + $0x940] sm:$0xff]  ;;  %v371_v60 = vld [vmem:[%s4801_s1 + $0x518] sm:$0xff] }
  0xd8   : > { %v2588_v3 = vpack.c.bf16 %v516_v0, %v504_v63  ;;  %v358_v63 = vld [vmem:[%s4801_s1 + $0x4b0] sm:$0xff] }
  0xd9   : > { %v370_v0 = vld [vmem:[%s4801_s1 + $0x510] sm:$0xff] }
  0xda   : > { %2549 = vmatpush1.bf16.msra.mxu0 %v2548_v4  ;;  %v2590_v4 = vpack.c.bf16 %v541_v2, %v529_v1  ;;  %v383_v1 = vld [vmem:[%s4801_s1 + $0x578] sm:$0xff] }
  0xdb   : > { %2551 = vmatprep.subr.bf16.mxu0 %v2550_v5  ;;  %v528_v5 = vld [vmem:[%s4801_s1 + $0xa00] sm:$0xff]  ;;  %v395_v2 = vld [vmem:[%s4801_s1 + $0x5d8] sm:$0xff] }
  0xdc   : > { %v2592_v9 = vpack.c.bf16 %v540_v6, %v528_v5  ;;  %v382_v5 = vld [vmem:[%s4801_s1 + $0x570] sm:$0xff] }
  0xdd   : > { %v394_v6 = vld [vmem:[%s4801_s1 + $0x5d0] sm:$0xff] }
  0xde   : > { %2553 = vmatpush1.bf16.msra.mxu0 %v2552_v41  ;;  %v2594_v41 = vpack.c.bf16 %v565_v8, %v553_v7  ;;  %v407_v7 = vld [vmem:[%s4801_s1 + $0x638] sm:$0xff] }
  0xdf   : > { %2555 = vmatprep.subr.bf16.mxu0 %v2554_v10  ;;  %v552_v10 = vld [vmem:[%s4801_s1 + $0xac0] sm:$0xff]  ;;  %v419_v8 = vld [vmem:[%s4801_s1 + $0x698] sm:$0xff] }
  0xe0   : > { %v2596_v14 = vpack.c.bf16 %v564_v11, %v552_v10  ;;  %v406_v10 = vld [vmem:[%s4801_s1 + $0x630] sm:$0xff] }
  0xe1   : > { %v418_v11 = vld [vmem:[%s4801_s1 + $0x690] sm:$0xff] }
  0xe2   : > { %2557 = vmatpush1.bf16.msra.mxu0 %v2556_v15  ;;  %v2598_v15 = vpack.c.bf16 %v589_v13, %v577_v12  ;;  %v431_v12 = vld [vmem:[%s4801_s1 + $0x6f8] sm:$0xff] }
  0xe3   : > { %2559 = vmatprep.subr.bf16.mxu0 %v2558_v16  ;;  %v576_v16 = vld [vmem:[%s4801_s1 + $0xb80] sm:$0xff]  ;;  %v443_v13 = vld [vmem:[%s4801_s1 + $0x758] sm:$0xff] }
  0xe4   : > { %v2600_v18 = vpack.c.bf16 %v588_v17, %v576_v16  ;;  %v430_v16 = vld [vmem:[%s4801_s1 + $0x6f0] sm:$0xff] }
  0xe5   : > { %v442_v17 = vld [vmem:[%s4801_s1 + $0x750] sm:$0xff] }
  0xe6   : > { %2561 = vmatpush1.bf16.msra.mxu0 %v2560_v21 }
  0xe7   : > { %2563 = vmatprep.subr.bf16.mxu0 %v2562_v22 }
  0xea   : > { %2565 = vmatpush1.bf16.msra.mxu0 %v2564_v27 }
  0xeb   : > { %2567 = vmatprep.subr.bf16.mxu0 %v2566_v28  ;;  %v2478_v28 = vpack.c.bf16 %v251_v26, %v239_v25  ;;  %v491_v25 = vld [vmem:[%s4801_s1 + $0x8d8] sm:$0xff] }
  0xee   : > { %2569 = vmatpush1.bf16.msra.mxu0 %v2568_v33  ;;  %v2480_v33 = vpack.c.bf16 %v250_v30, %v238_v29  ;;  %v478_v29 = vld [vmem:[%s4801_s1 + $0x870] sm:$0xff] }
  0xef   : > { %2571 = vmatprep.subr.bf16.mxu0 %v2570_v34  ;;  %v2482_v34 = vpack.c.bf16 %v275_v32, %v263_v31  ;;  %v490_v30 = vld [vmem:[%s4801_s1 + $0x8d0] sm:$0xff]  ;;  %v503_v32 = vld [vmem:[%s4801_s1 + $0x938] sm:$0xff] }
  0xf2   : > { %2573 = vmatpush1.bf16.msra.mxu0 %v2572_v39  ;;  %v2484_v39 = vpack.c.bf16 %v274_v36, %v262_v35 }
  0xf3   : > { %2575 = vmatprep.subr.bf16.mxu0 %v2574_v42  ;;  %v2486_v42 = vpack.c.bf16 %v299_v38, %v287_v37  ;;  %v502_v37 = vld [vmem:[%s4801_s1 + $0x930] sm:$0xff] }
  0xf4   : > { %v514_v38 = vld [vmem:[%s4801_s1 + $0x990] sm:$0xff] }
  0xf6   : > { %2577 = vmatpush1.bf16.msra.mxu0 %v2576_v48  ;;  %v2488_v48 = vpack.c.bf16 %v298_v44, %v286_v43  ;;  %v539_v43 = vld [vmem:[%s4801_s1 + $0xa58] sm:$0xff]  ;;  %v2524_v44 = vpack.c.bf16 %v514_v38, %v502_v37  ;;  %v338_v38 = vld [vmem:[%s4801_s1 + $0x410] sm:$0xff] }
  0xf7   : > { %2579 = vmatprep.subr.bf16.mxu0 %v2578_v49  ;;  %v2490_v49 = vpack.c.bf16 %v323_v47, %v311_v45  ;;  %v526_v47 = vld [vmem:[%s4801_s1 + $0x9f0] sm:$0xff] }
  0xfa   : > { %2581 = vmatpush1.bf16.msra.mxu0 %v2580_v55  ;;  %v2492_v55 = vpack.c.bf16 %v322_v52, %v310_v51  ;;  %v563_v51 = vld [vmem:[%s4801_s1 + $0xb18] sm:$0xff] }
  0xfb   : > { %2583 = vmatprep.subr.bf16.mxu0 %v2582_v56  ;;  %v2494_v56 = vpack.c.bf16 %v347_v54, %v335_v53  ;;  %v550_v54 = vld [vmem:[%s4801_s1 + $0xab0] sm:$0xff] }
  0xfe   : > { %2585 = vmatpush1.bf16.msra.mxu0 %v2584_v61  ;;  %v2496_v61 = vpack.c.bf16 %v346_v58, %v334_v57  ;;  %v587_v57 = vld [vmem:[%s4801_s1 + $0xbd8] sm:$0xff] }
  0xff   : > { %2587 = vmatprep.subr.bf16.mxu0 %v2586_v62  ;;  %v2498_v62 = vpack.c.bf16 %v371_v60, %v359_v59  ;;  %v574_v60 = vld [vmem:[%s4801_s1 + $0xb70] sm:$0xff] }
 0x102   : > { %2589 = vmatpush1.bf16.msra.mxu0 %v2588_v3  ;;  %v2500_v3 = vpack.c.bf16 %v370_v0, %v358_v63  ;;  %v231_v63 = vld [vmem:[%s4801_s1 + $0xb8] sm:$0xff] }
 0x103   : > { %2591 = vmatprep.subr.bf16.mxu0 %v2590_v4  ;;  %v2502_v4 = vpack.c.bf16 %v395_v2, %v383_v1  ;;  %v218_v2 = vld [vmem:[%s4801_s1 + $0x50] sm:$0xff] }
 0x106   : > { %2593 = vmatpush1.bf16.msra.mxu0 %v2592_v9  ;;  %v2504_v9 = vpack.c.bf16 %v394_v6, %v382_v5  ;;  %v255_v5 = vld [vmem:[%s4801_s1 + $0x178] sm:$0xff] }
 0x107   : > { %2595 = vmatprep.subr.bf16.mxu0 %v2594_v41  ;;  %v2506_v41 = vpack.c.bf16 %v419_v8, %v407_v7  ;;  %v242_v8 = vld [vmem:[%s4801_s1 + $0x110] sm:$0xff] }
 0x10a   : > { %2597 = vmatpush1.bf16.msra.mxu0 %v2596_v14  ;;  %v2508_v14 = vpack.c.bf16 %v418_v11, %v406_v10  ;;  %v279_v10 = vld [vmem:[%s4801_s1 + $0x238] sm:$0xff]  ;;  %v4092_v11 = vld [vmem:[%s3134_s6] sm:$0xff] }
 0x10b   : > { %2599 = vmatprep.subr.bf16.mxu0 %v2598_v15  ;;  %v2510_v15 = vpack.c.bf16 %v443_v13, %v431_v12  ;;  %v4096_v13 = vld [vmem:[%s3134_s6 + $0x18] sm:$0xff] }
 0x10e   : > { %2601 = vmatpush1.bf16.msra.mxu0 %v2600_v18  ;;  %v455_v18 = vld [vmem:[%s4801_s1 + $0x7b8] sm:$0xff] }
 0x111   : > { %965 = vmatmul.mubr.f32.vlgmr.msra.gmra.mrb[12].mxu0 %v3274_v40  ;;  %v227_v40 = vld [vmem:[%s4801_s1 + $0x98] sm:$0xff] }
 0x112   : > { %970 = vmatprep.mubr.f32.mxu0 %v3283_v46  ;;  %v214_v46 = vld [vmem:[%s4801_s1 + $0x30] sm:$0xff] }
 0x113   : > { %v2476_v27 = vpack.c.bf16 %v226_v24, %v214_v46  ;;  %v454_v46 = vld [vmem:[%s4801_s1 + $0x7b0] sm:$0xff]  ;;  %v479_v24 = vld [vmem:[%s4801_s1 + $0x878] sm:$0xff] }
 0x115   : > { %971 = vmatmul.mubr.f32.gmra.mrb[14].mxu0 %v3294_v50  ;;  %v2474_v50 = vpack.c.bf16 %v227_v40, %v215_v23  ;;  %v2512_v23 = vpack.c.bf16 %v442_v17, %v430_v16  ;;  %v278_v16 = vld [vmem:[%s4801_s1 + $0x230] sm:$0xff]  ;;  %v291_v17 = vld [vmem:[%s4801_s1 + $0x298] sm:$0xff] }
 0x117   : > { %2475 = vmatprep.subr.bf16.mxu1 %v2474_v50  ;;  %v466_v50 = vld [vmem:[%s4801_s1 + $0x810] sm:$0xff] }
 0x118   : > { %2477 = vmatpush1.bf16.msra.mxu1 %v2476_v27  ;;  %v2516_v26 = vpack.c.bf16 %v466_v50, %v454_v46  ;;  %v290_v50 = vld [vmem:[%s4801_s1 + $0x290] sm:$0xff] }
 0x119   : > { %2479 = vmatprep.subr.bf16.mxu1 %v2478_v28  ;;  %v2518_v28 = vpack.c.bf16 %v491_v25, %v479_v24  ;;  %v302_v24 = vld [vmem:[%s4801_s1 + $0x2f0] sm:$0xff]  ;;  %v315_v25 = vld [vmem:[%s4801_s1 + $0x358] sm:$0xff] }
 0x11c   : > { %2481 = vmatpush1.bf16.msra.mxu1 %v2480_v33  ;;  %v515_v33 = vld [vmem:[%s4801_s1 + $0x998] sm:$0xff] }
 0x11d   : > { %2483 = vmatprep.subr.bf16.mxu1 %v2482_v34  ;;  %v2520_v34 = vpack.c.bf16 %v490_v30, %v478_v29  ;;  %v2522_v36 = vpack.c.bf16 %v515_v33, %v503_v32  ;;  %v314_v30 = vld [vmem:[%s4801_s1 + $0x350] sm:$0xff]  ;;  %v339_v33 = vld [vmem:[%s4801_s1 + $0x418] sm:$0xff] }
 0x11e   : > { %v326_v32 = vld [vmem:[%s4801_s1 + $0x3b0] sm:$0xff] }
 0x120   : > { %2485 = vmatpush1.bf16.msra.mxu1 %v2484_v39 }
 0x121   : > { %2487 = vmatprep.subr.bf16.mxu1 %v2486_v42  ;;  %v527_v42 = vld [vmem:[%s4801_s1 + $0x9f8] sm:$0xff] }
 0x122   : > { %v2526_v45 = vpack.c.bf16 %v539_v43, %v527_v42  ;;  %v350_v42 = vld [vmem:[%s4801_s1 + $0x470] sm:$0xff]  ;;  %v363_v43 = vld [vmem:[%s4801_s1 + $0x4d8] sm:$0xff] }
 0x124   : > { %v658_v19 = vpop.f32.mrb[0].mxu0  ;;  %2489 = vmatpush1.bf16.msra.mxu1 %v2488_v48  ;;  %v538_v48 = vld [vmem:[%s4801_s1 + $0xa50] sm:$0xff] }
 0x125   : > { %v3855_v20 = vpop.f32.mrb[1].mxu0  ;;  %2230 = vmatprep.mubr.f32.mxu0 %v658_v19  ;;  %2491 = vmatprep.subr.bf16.mxu1 %v2490_v49  ;;  %v467_v19 = vld [vmem:[%s4801_s1 + $0x818] sm:$0xff]  ;;  %v2528_v52 = vpack.c.bf16 %v538_v48, %v526_v47  ;;  %v362_v48 = vld [vmem:[%s4801_s1 + $0x4d0] sm:$0xff] }
 0x126   : > { %v2514_v40 = vpack.c.bf16 %v467_v19, %v455_v18  ;;  %v551_v49 = vld [vmem:[%s4801_s1 + $0xab8] sm:$0xff]  ;;  %v4112_v19 = vld [vmem:[%s3134_s6 + $0x10] sm:$0xff] }
 0x127   : > { %v2530_v53 = vpack.c.bf16 %v563_v51, %v551_v49  ;;  %v303_v18 = vld [vmem:[%s4801_s1 + $0x2f8] sm:$0xff]  ;;  %v374_v49 = vld [vmem:[%s4801_s1 + $0x530] sm:$0xff] }
 0x128   : > { %v3857_v21 = vpop.f32.mrb[2].mxu0  ;;  %2493 = vmatpush1.bf16.msra.mxu1 %v2492_v55  ;;  %v562_v55 = vld [vmem:[%s4801_s1 + $0xb10] sm:$0xff]  ;;  %v2614_v46 = vpack.c.bf16 %v303_v18, %v291_v17  ;;  %v387_v51 = vld [vmem:[%s4801_s1 + $0x598] sm:$0xff] }
 0x129   : > { %v3859_v22 = vpop.f32.mrb[3].mxu0  ;;  %2495 = vmatprep.subr.bf16.mxu1 %v2494_v56  ;;  %v575_v56 = vld [vmem:[%s4801_s1 + $0xb78] sm:$0xff]  ;;  %v2532_v58 = vpack.c.bf16 %v562_v55, %v550_v54  ;;  %v386_v55 = vld [vmem:[%s4801_s1 + $0x590] sm:$0xff] }
 0x12a   : > { %v2534_v59 = vpack.c.bf16 %v587_v57, %v575_v56  ;;  %v398_v56 = vld [vmem:[%s4801_s1 + $0x5f0] sm:$0xff]  ;;  %v411_v57 = vld [vmem:[%s4801_s1 + $0x658] sm:$0xff] }
 0x12b   : > { %v482_v17 = vld [vmem:[%s4801_s1 + $0x890] sm:$0xff] }
 0x12c   : > { %2497 = vmatpush1.bf16.msra.mxu1 %v2496_v61  ;;  %v586_v61 = vld [vmem:[%s4801_s1 + $0xbd0] sm:$0xff] }
 0x12d   : > { %2499 = vmatprep.subr.bf16.mxu1 %v2498_v62  ;;  %v219_v62 = vld [vmem:[%s4801_s1 + $0x58] sm:$0xff]  ;;  %v2536_v0 = vpack.c.bf16 %v586_v61, %v574_v60  ;;  %v410_v61 = vld [vmem:[%s4801_s1 + $0x650] sm:$0xff] }
 0x12e   : > { %v2602_v1 = vpack.c.bf16 %v231_v63, %v219_v62  ;;  %v422_v62 = vld [vmem:[%s4801_s1 + $0x6b0] sm:$0xff]  ;;  %v435_v63 = vld [vmem:[%s4801_s1 + $0x718] sm:$0xff] }
 0x12f   : > { %v494_v18 = vld [vmem:[%s4801_s1 + $0x8f0] sm:$0xff] }
 0x130   : > { %2501 = vmatpush1.bf16.msra.mxu1 %v2500_v3  ;;  %v230_v3 = vld [vmem:[%s4801_s1 + $0xb0] sm:$0xff] }
 0x131   : > { %2503 = vmatprep.subr.bf16.mxu1 %v2502_v4  ;;  %v243_v4 = vld [vmem:[%s4801_s1 + $0x118] sm:$0xff]  ;;  %v2604_v6 = vpack.c.bf16 %v230_v3, %v218_v2  ;;  %v434_v3 = vld [vmem:[%s4801_s1 + $0x710] sm:$0xff] }
 0x132   : > { %v2606_v7 = vpack.c.bf16 %v255_v5, %v243_v4  ;;  %v446_v4 = vld [vmem:[%s4801_s1 + $0x770] sm:$0xff]  ;;  %v459_v5 = vld [vmem:[%s4801_s1 + $0x7d8] sm:$0xff] }
 0x134   : > { %2505 = vmatpush1.bf16.msra.mxu1 %v2504_v9  ;;  %v254_v9 = vld [vmem:[%s4801_s1 + $0x170] sm:$0xff] }
 0x135   : > { %2507 = vmatprep.subr.bf16.mxu1 %v2506_v41  ;;  %v267_v41 = vld [vmem:[%s4801_s1 + $0x1d8] sm:$0xff]  ;;  %v2608_v12 = vpack.c.bf16 %v254_v9, %v242_v8  ;;  %v458_v9 = vld [vmem:[%s4801_s1 + $0x7d0] sm:$0xff] }
 0x138   : > { %2509 = vmatpush1.bf16.msra.mxu1 %v2508_v14  ;;  %v2610_v14 = vpack.c.bf16 %v279_v10, %v267_v41  ;;  %v470_v41 = vld [vmem:[%s4801_s1 + $0x830] sm:$0xff]  ;;  %v483_v10 = vld [vmem:[%s4801_s1 + $0x898] sm:$0xff] }
 0x139   : > { %2511 = vmatprep.subr.bf16.mxu1 %v2510_v15  ;;  %v266_v15 = vld [vmem:[%s4801_s1 + $0x1d0] sm:$0xff] }
 0x13c   : > { %2513 = vmatpush1.bf16.msra.mxu1 %v2512_v23  ;;  %v2612_v23 = vpack.c.bf16 %v278_v16, %v266_v15 }
 0x13d   : > { %2515 = vmatprep.subr.bf16.mxu1 %v2514_v40  ;;  %v2910_v40 = vld [vmem:[%s3134_s6 + $0x8] sm:$0xff]  ;;  %s4757_s6 = scalar_lea.hbm %s4804_s4, %s2193_s30 }
 0x140   : > { %2517 = vmatpush1.bf16.msra.mxu1 %v2516_v26  ;;  %v327_v26 = vld [vmem:[%s4801_s1 + $0x3b8] sm:$0xff] }
 0x141   : > { %2519 = vmatprep.subr.bf16.mxu1 %v2518_v28  ;;  %v2616_v28 = vpack.c.bf16 %v302_v24, %v290_v50  ;;  %v2618_v29 = vpack.c.bf16 %v327_v26, %v315_v25  ;;  %v2648_v50 = vpack.c.bf16 %v494_v18, %v482_v17  ;;  %v506_v26 = vld [vmem:[%s4801_s1 + $0x950] sm:$0xff] }
 0x144   : > { %2521 = vmatpush1.bf16.msra.mxu1 %v2520_v34  ;;  %v351_v34 = vld [vmem:[%s4801_s1 + $0x478] sm:$0xff] }
 0x145   : > { %2523 = vmatprep.subr.bf16.mxu1 %v2522_v36  ;;  %v2620_v36 = vpack.c.bf16 %v326_v32, %v314_v30  ;;  %v2622_v37 = vpack.c.bf16 %v351_v34, %v339_v33  ;;  %v531_v32 = vld [vmem:[%s4801_s1 + $0xa18] sm:$0xff] }
 0x146   : > { %v543_v33 = vld [vmem:[%s4801_s1 + $0xa78] sm:$0xff] }
 0x148   : > { %2525 = vmatpush1.bf16.msra.mxu1 %v2524_v44  ;;  %v375_v44 = vld [vmem:[%s4801_s1 + $0x538] sm:$0xff] }
 0x149   : > { %2527 = vmatprep.subr.bf16.mxu1 %v2526_v45  ;;  %v2624_v45 = vpack.c.bf16 %v350_v42, %v338_v38  ;;  %v2626_v47 = vpack.c.bf16 %v375_v44, %v363_v43  ;;  %v530_v38 = vld [vmem:[%s4801_s1 + $0xa10] sm:$0xff]  ;;  %v555_v43 = vld [vmem:[%s4801_s1 + $0xad8] sm:$0xff] }
 0x14a   : > { %v542_v42 = vld [vmem:[%s4801_s1 + $0xa70] sm:$0xff]  ;;  %v567_v44 = vld [vmem:[%s4801_s1 + $0xb38] sm:$0xff] }
 0x14c   : > { %2529 = vmatpush1.bf16.msra.mxu1 %v2528_v52  ;;  %v399_v52 = vld [vmem:[%s4801_s1 + $0x5f8] sm:$0xff] }
 0x14d   : > { %2531 = vmatprep.subr.bf16.mxu1 %v2530_v53  ;;  %v2628_v53 = vpack.c.bf16 %v374_v49, %v362_v48  ;;  %v2630_v54 = vpack.c.bf16 %v399_v52, %v387_v51  ;;  %v566_v48 = vld [vmem:[%s4801_s1 + $0xb30] sm:$0xff]  ;;  %v2658_v49 = vpack.c.bf16 %v567_v44, %v555_v43  ;;  %v579_v51 = vld [vmem:[%s4801_s1 + $0xb98] sm:$0xff] }
 0x14e   : > { %v591_v52 = vld [vmem:[%s4801_s1 + $0xbf8] sm:$0xff] }
 0x150   : > { %2533 = vmatpush1.bf16.msra.mxu1 %v2532_v58  ;;  %v423_v58 = vld [vmem:[%s4801_s1 + $0x6b8] sm:$0xff] }
 0x151   : > { %2535 = vmatprep.subr.bf16.mxu1 %v2534_v59  ;;  %v2632_v59 = vpack.c.bf16 %v398_v56, %v386_v55  ;;  %v2634_v60 = vpack.c.bf16 %v423_v58, %v411_v57  ;;  %v578_v55 = vld [vmem:[%s4801_s1 + $0xb90] sm:$0xff] }
 0x152   : > { %v590_v56 = vld [vmem:[%s4801_s1 + $0xbf0] sm:$0xff] }
 0x153   : > { %v2664_v57 = vpack.c.bf16 %v590_v56, %v578_v55 }
 0x154   : > { %2537 = vmatpush1.bf16.msra.mxu1 %v2536_v0  ;;  %v447_v0 = vld [vmem:[%s4801_s1 + $0x778] sm:$0xff] }
 0x155   : > { %2603 = vmatprep.subr.bf16.mxu1 %v2602_v1  ;;  %v2636_v1 = vpack.c.bf16 %v422_v62, %v410_v61  ;;  %v2638_v2 = vpack.c.bf16 %v447_v0, %v435_v63  ;;  %v196_v62 = vlaneseq }
 0x157   : > { %888 = vmatmul.mubr.f32.vlgmr.msra.gmra.mrb[0].mxu1 %v4092_v11  ;;  %v4277_v63 = vand.u32 127, %v196_v62 }
 0x158   : > { %2605 = vmatpush1.bf16.msra.mxu1 %v2604_v6  ;;  %893 = vmatprep.mubr.f32.mxu1 %v4096_v13  ;;  %v471_v6 = vld [vmem:[%s4801_s1 + $0x838] sm:$0xff] }
 0x159   : > { %2607 = vmatprep.subr.bf16.mxu1 %v2606_v7  ;;  %v2640_v7 = vpack.c.bf16 %v446_v4, %v434_v3  ;;  %v2642_v8 = vpack.c.bf16 %v471_v6, %v459_v5 }
 0x15b   : > { %894 = vmatmul.mubr.f32.gmra.mrb[2].mxu1 %v4112_v19 }
 0x15c   : > { %2609 = vmatpush1.bf16.msra.mxu1 %v2608_v12  ;;  %1041 = vmatprep.mubr.f32.mxu1 %v2910_v40  ;;  %v495_v12 = vld [vmem:[%s4801_s1 + $0x8f8] sm:$0xff] }
 0x15d   : > { %2611 = vmatprep.subr.bf16.mxu1 %v2610_v14  ;;  %v2644_v14 = vpack.c.bf16 %v470_v41, %v458_v9  ;;  %v2646_v16 = vpack.c.bf16 %v495_v12, %v483_v10  ;;  %v507_v40 = vld [vmem:[%s4801_s1 + $0x958] sm:$0xff] }
 0x160   : > { %2613 = vmatpush1.bf16.msra.mxu1 %v2612_v23 }
 0x161   : > { %2615 = vmatprep.subr.bf16.mxu1 %v2614_v46  ;;  %v519_v46 = vld [vmem:[%s4801_s1 + $0x9b8] sm:$0xff] }
 0x162   : > { %v2650_v25 = vpack.c.bf16 %v519_v46, %v507_v40 }
 0x164   : > { %v3999_v27 = vpop.f32.mrb[4].mxu0  ;;  %2617 = vmatpush1.bf16.msra.mxu1 %v2616_v28  ;;  %v518_v28 = vld [vmem:[%s4801_s1 + $0x9b0] sm:$0xff] }
 0x165   : > { %v4007_v31 = vpop.f32.mrb[5].mxu0  ;;  %2619 = vmatprep.subr.bf16.mxu1 %v2618_v29 }
 0x168   : > { %v4015_v35 = vpop.f32.mrb[6].mxu0  ;;  %2621 = vmatpush1.bf16.msra.mxu1 %v2620_v36  ;;  %v2652_v36 = vpack.c.bf16 %v518_v28, %v506_v26 }
 0x169   : > { %v4023_v39 = vpop.f32.mrb[7].mxu0  ;;  %2623 = vmatprep.subr.bf16.mxu1 %v2622_v37  ;;  %v2654_v37 = vpack.c.bf16 %v543_v33, %v531_v32 }
 0x16c   : > { %2625 = vmatpush1.bf16.msra.mxu1 %v2624_v45  ;;  %v2656_v45 = vpack.c.bf16 %v542_v42, %v530_v38 }
 0x16d   : > { %2627 = vmatprep.subr.bf16.mxu1 %v2626_v47  ;;  %v554_v47 = vld [vmem:[%s4801_s1 + $0xad0] sm:$0xff] }
 0x170   : > { %2629 = vmatpush1.bf16.msra.mxu1 %v2628_v53  ;;  %v2660_v53 = vpack.c.bf16 %v566_v48, %v554_v47 }
 0x171   : > { %2631 = vmatprep.subr.bf16.mxu1 %v2630_v54  ;;  %v2662_v54 = vpack.c.bf16 %v591_v52, %v579_v51 }
 0x174   : > { %2633 = vmatpush1.bf16.msra.mxu1 %v2632_v59 }
 0x175   : > { %2635 = vmatprep.subr.bf16.mxu1 %v2634_v60 }
 0x178   : > { %2637 = vmatpush1.bf16.msra.mxu1 %v2636_v1 }
 0x179   : > { %2639 = vmatprep.subr.bf16.mxu1 %v2638_v2 }
 0x17c   : > { %2641 = vmatpush1.bf16.msra.mxu1 %v2640_v7 }
 0x17d   : > { %2643 = vmatprep.subr.bf16.mxu1 %v2642_v8 }
 0x180   : > { %2645 = vmatpush1.bf16.msra.mxu1 %v2644_v14 }
 0x181   : > { %2647 = vmatprep.subr.bf16.mxu1 %v2646_v16 }
 0x184   : > { %2649 = vmatpush1.bf16.msra.mxu1 %v2648_v50 }
 0x185   : > { %2651 = vmatprep.subr.bf16.mxu1 %v2650_v25 }
 0x188   : > { %2653 = vmatpush1.bf16.msra.mxu1 %v2652_v36 }
 0x189   : > { %2655 = vmatprep.subr.bf16.mxu1 %v2654_v37 }
 0x18c   : > { %2657 = vmatpush1.bf16.msra.mxu1 %v2656_v45 }
 0x18d   : > { %2659 = vmatprep.subr.bf16.mxu1 %v2658_v49 }
 0x190   : > { %2661 = vmatpush1.bf16.msra.mxu1 %v2660_v53 }
 0x191   : > { %2663 = vmatprep.subr.bf16.mxu1 %v2662_v54 }
 0x194   : > { %2665 = vmatpush1.bf16.msra.mxu1 %v2664_v57 }
 0x197   : > { %1042 = vmatmul.mubr.f32.vlgmr.msra.gmra.mrb[4].mxu1 %v4092_v11 }
 0x198   : > { %1047 = vmatprep.mubr.f32.mxu1 %v4096_v13 }
 0x19b   : > { %1048 = vmatmul.mubr.f32.gmra.mrb[6].mxu1 %v4112_v19 }
 0x1a4   : > { %v812_v15 = vpop.f32.mrb[8].mxu0 }
 0x1a5   : > { %v814_v23 = vpop.f32.mrb[9].mxu0 }
 0x1a8   : > { %v818_v24 = vpop.f32.mrb[10].mxu0 }
 0x1a9   : > { %v2666_v29 = vpack.c.bf16 %v818_v24, %v812_v15  ;;  %v820_v30 = vpop.f32.mrb[11].mxu0 }
 0x1aa   : > { %v2674_v34 = vpack.c.bf16 %v820_v30, %v814_v23 }
 0x1ab   : > { %2667 = vmatprep.subr.bf16.mxu0 %v2666_v29 }
 0x1ac   : > { %2669 = vmatpush3.bf16.xpose.msra.mxu0 %v2666_v29 }
 0x1ad   : > { %2675 = vmatprep.subr.bf16.mxu0 %v2674_v34 }
 0x1b3   : > { %2231 = vmatmul.mubr.f32.vlgmr.msra.gmra.mrb[16].mxu0 %v3857_v21 }
 0x1b4   : > { %2677 = vmatpush3.bf16.xpose.msra.mxu0 %v2674_v34  ;;  %2244 = vmatprep.mubr.f32.mxu0 %v3855_v20 }
 0x1bb   : > { %2245 = vmatmul.mubr.f32.vlgmr.msra.gmra.mrb[18].mxu0 %v3859_v22  ;;  %v4275_v22 = vshrl.u32 %v196_v62, 7 }
 0x1bd   : > { %v4280_v11 = vadd.s32 8, %v4275_v22  ;;  %vm201_vm0 = vcmp.ge.s32.totalorder %v4275_v22, %v4277_v63 }
 0x1bf   : > { %vm202_vm2 = vcmp.ge.s32.totalorder %v4280_v11, %v4277_v63 }
 0x1e4   : > { %v966_v20 = vpop.f32.mrb[12].mxu0 }
 0x1e5   : > { %v968_v21 = vpop.f32.mrb[13].mxu0 }
 0x1e8   : > { %v972_v58 = vpop.f32.mrb[14].mxu0 }
 0x1e9   : > { %v2670_v59 = vpack.c.bf16 %v972_v58, %v966_v20  ;;  %v974_v60 = vpop.f32.mrb[15].mxu0 }
 0x1ea   : > { %v4272_v61 = vpack.c.bf16 %v974_v60, %v968_v21 }
 0x1eb   : > { %2671 = vmatprep.subr.bf16.mxu1 %v2670_v59 }
 0x1ec   : > { %2673 = vmatpush3.bf16.msra.mxu1 %v2670_v59 }
 0x1ed   : > { %2679 = vmatprep.subr.bf16.mxu1 %v4272_v61 }
 0x22a   : > { %v889_v15 = vpop.f32.mrb[0].mxu1 }
 0x22b   : > { %v891_v16 = vpop.f32.mrb[1].mxu1 }
 0x22e   : > { %v895_v17 = vpop.f32.mrb[2].mxu1 }
 0x22f   : > { %v897_v18 = vpop.f32.mrb[3].mxu1  ;;  %v2682_v23 = vpack.c.bf16 %v895_v17, %v889_v15  ;;  %v1802_v17 = vld [vmem:[%s4802_s2 + $0x18] sm:$0xff] }
 0x230   : > { %v4302_v40 = vpack.c.bf16 %v897_v18, %v891_v16  ;;  %v1800_v16 = vld [vmem:[%s4802_s2 + $0x8] sm:$0xff] }
 0x231   : > { %v2698_v18 = vpack.c.bf16 %v1802_v17, %v1800_v16  ;;  %v1827_v16 = vld [vmem:[%s4802_s2 + $0xe0] sm:$0xff]  ;;  %v1829_v17 = vld [vmem:[%s4802_s2 + $0xf0] sm:$0xff] }
 0x26a   : > { %v1043_v46 = vpop.f32.mrb[4].mxu1 }
 0x26b   : > { %v1045_v50 = vpop.f32.mrb[5].mxu1 }
 0x26e   : > { %v1049_v24 = vpop.f32.mrb[6].mxu1 }
 0x26f   : > { %v2686_v25 = vpack.c.bf16 %v1049_v24, %v1043_v46  ;;  %v1051_v26 = vpop.f32.mrb[7].mxu1 }
 0x270   : > { %v2694_v28 = vpack.c.bf16 %v1051_v26, %v1045_v50 }
 0x271   : > { %2687 = vmatprep.subr.bf16.mxu0 %v2686_v25 }
 0x272   : > { %2689 = vmatpush3.bf16.msra.mxu0 %v2686_v25 }
 0x273   : > { %2691 = vmatprep.subr.bf16.mxu0 %v4302_v40 }
 0x286   : > { %v2232_v13 = vpop.f32.mrb[16].mxu0 }
 0x287   : > { %v1120_v19 = vpop.f32.mrb[17].mxu0  ;;  %v1130_v0 = vmul.f32 0.16903085, %v2232_v13 }
 0x288   : > { %v1129_v1 = vmul.f32 0.16903085, %v1120_v19 }
 0x289   : > { %v1132_v4 = vsel %vm202_vm2, %v1130_v0, -1e+30 }
 0x28a   : > { %v1131_v2 = vsel %vm201_vm0, %v1129_v1, -1e+30  ;;  %v1137_v7 = vsel %vm1133_vm1, %v1132_v4, -inf }
 0x28b   : > { %v1134_v3 = vsel %vm1133_vm1, %v1131_v2, -inf }
 0x28c   : > { %1135 = vmax.xlane.f32.xlu0 %v1134_v3 }
 0x28e   : > { %v2246_v5 = vpop.f32.mrb[18].mxu0 }
 0x28f   : > { %v1305_v6 = vpop.f32.mrb[19].mxu0  ;;  %v1315_v8 = vmul.f32 0.16903085, %v2246_v5 }
 0x290   : > { %v1314_v9 = vmul.f32 0.16903085, %v1305_v6  ;;  %1138 = vmax.xlane.f32.xlu0 %v1137_v7 }
 0x291   : > { %v1317_v12 = vsel %vm202_vm2, %v1315_v8, -1e+30 }
 0x292   : > { %v1316_v41 = vsel %vm201_vm0, %v1314_v9, -1e+30  ;;  %v1321_v14 = vsel %vm1133_vm1, %v1317_v12, -inf }
 0x293   : > { %v1318_v10 = vsel %vm1133_vm1, %v1316_v41, -inf }
 0x294   : > { %1319 = vmax.xlane.f32.xlu1 %v1318_v10 }
 0x298   : > { %1322 = vmax.xlane.f32.xlu1 %v1321_v14 }
 0x319   : > { %v1136_v29 = vpop.xlane.xlu0 %1135 }
 0x31a   : > { %v1140_v30 = vsub.f32 %v1131_v2, %v1136_v29  ;;  %v1801_v29 = vld [vmem:[%s4802_s2 + $0x10] sm:$0xff] }
 0x31c   : > { %v1142_v32 = vmul.f32 1.442695, %v1140_v30  ;;  %v1804_v30 = vld [vmem:[%s4802_s2 + $0x28] sm:$0xff] }
 0x31d   : > { %v1139_v33 = vpop.xlane.xlu0 %1138 }
 0x31e   : > { %2875 = vpow2.f32 %v1142_v32  ;;  %v1141_v34 = vsub.f32 %v1132_v4, %v1139_v33  ;;  %v1806_v32 = vld [vmem:[%s4802_s2 + $0x38] sm:$0xff] }
 0x320   : > { %v1144_v36 = vmul.f32 1.442695, %v1141_v34 }
 0x321   : > { %v1320_v37 = vpop.xlane.xlu1 %1319 }
 0x322   : > { %2877 = vpow2.f32 %v1144_v36  ;;  %v1324_v38 = vsub.f32 %v1316_v41, %v1320_v37  ;;  %v2702_v36 = vpack.c.bf16 %v1806_v32, %v1804_v30  ;;  %v1803_v37 = vld [vmem:[%s4802_s2 + $0x20] sm:$0xff]  ;;  %v1837_v32 = vld [vmem:[%s4802_s2 + $0x130] sm:$0xff] }
 0x323   : > { %v1835_v30 = vld [vmem:[%s4802_s2 + $0x120] sm:$0xff] }
 0x324   : > { %v1326_v42 = vmul.f32 1.442695, %v1324_v38  ;;  %v1805_v38 = vld [vmem:[%s4802_s2 + $0x30] sm:$0xff] }
 0x325   : > { %v1323_v43 = vpop.xlane.xlu1 %1322 }
 0x326   : > { %2879 = vpow2.f32 %v1326_v42  ;;  %v1325_v44 = vsub.f32 %v1317_v12, %v1323_v43 }
 0x328   : > { %v2876_v45 = vpop.eup %2875  ;;  %v1328_v47 = vmul.f32 1.442695, %v1325_v44  ;;  %v1808_v44 = vld [vmem:[%s4802_s2 + $0x48] sm:$0xff] }
 0x329   : > { %2237 = vmatprep.mubr.msk.f32.mxu1 %vm1133_vm1, %v2876_v45  ;;  %v1146_v10 = vsel %vm1133_vm1, %v2876_v45, 0.0  ;;  %v1810_v45 = vld [vmem:[%s4802_s2 + $0x58] sm:$0xff] }
 0x32a   : > { %2881 = vpow2.f32 %v1328_v47 }
 0x32c   : > { %v2878_v48 = vpop.eup %2877 }
 0x32d   : > { %2238 = vmatmul.mubr.msk.f32.vlgmr.msra.gmra.mrb[8].mxu1 %vm1133_vm1, %v2878_v48  ;;  %v1149_v14 = vsel %vm1133_vm1, %v2878_v48, 0.0 }
 0x32e   : > { %2681 = vmatpush3.bf16.msra.mxu1 %v4272_v61 }
 0x32f   : > { %2683 = vmatprep.subr.bf16.mxu1 %v2682_v23 }
 0x330   : > { %v2880_v49 = vpop.eup %2879 }
 0x331   : > { %2251 = vmatprep.mubr.msk.f32.mxu1 %vm1133_vm1, %v2880_v49  ;;  %v1330_v12 = vsel %vm1133_vm1, %v2880_v49, 0.0  ;;  %v2704_v49 = vpack.c.bf16 %v1805_v38, %v1803_v37  ;;  %v1839_v38 = vld [vmem:[%s4802_s2 + $0x140] sm:$0xff] }
 0x334   : > { %v2882_v51 = vpop.eup %2881 }
 0x335   : > { %2252 = vmatmul.mubr.msk.f32.vlgmr.msra.gmra.mrb[10].mxu1 %vm1133_vm1, %v2882_v51  ;;  %v1333_v11 = vsel %vm1133_vm1, %v2882_v51, 0.0  ;;  %v2706_v51 = vpack.c.bf16 %v1810_v45, %v1808_v44  ;;  %v1846_v44 = vld [vmem:[%s4802_s2 + $0x178] sm:$0xff] }
 0x336   : > { %2258 = vmatprep.mubr.f32.mxu1 %v3999_v27 }
 0x337   : > { %2685 = vmatpush3.bf16.xpose.msra.mxu1 %v2682_v23 }
 0x338   : > { %2695 = vmatprep.subr.bf16.mxu1 %v2694_v28 }
 0x33e   : > { %2259 = vmatmul.mubr.f32.vlgmr.msra.gmra.mrb[12].mxu1 %v4015_v35 }
 0x33f   : > { %2697 = vmatpush3.bf16.msra.mxu1 %v2694_v28  ;;  %v1799_v28 = vld [vmem:[%s4802_s2] sm:$0xff] }
 0x340   : > { %2699 = vmatprep.subr.bf16.mxu1 %v2698_v18  ;;  %v2700_v33 = vpack.c.bf16 %v1801_v29, %v1799_v28  ;;  %v1832_v18 = vld [vmem:[%s4802_s2 + $0x108] sm:$0xff] }
 0x400   : > { %v4312_v52 = vpop.f32.mrb[8].mxu1 }
 0x401   : > { %v4314_v53 = vpop.f32.mrb[9].mxu1 }
 0x408   : > { %v4316_v54 = vpop.f32.mrb[10].mxu1 }
 0x409   : > { %v4318_v55 = vpop.f32.mrb[11].mxu1 }
 0x411   : > { %v2260_v56 = vpop.f32.mrb[12].mxu1 }
 0x412   : > { %v1499_v57 = vmul.f32 0.16903085, %v2260_v56  ;;  %v1489_v20 = vpop.f32.mrb[13].mxu1  ;;  %v1807_v56 = vld [vmem:[%s4802_s2 + $0x40] sm:$0xff] }
 0x413   : > { %v1498_v21 = vmul.f32 0.16903085, %v1489_v20 }
 0x414   : > { %v1501_v27 = vsel %vm202_vm2, %v1499_v57, -1e+30  ;;  %v1809_v57 = vld [vmem:[%s4802_s2 + $0x50] sm:$0xff] }
 0x415   : > { %v1505_v58 = vsel %vm1133_vm1, %v1501_v27, -inf  ;;  %v1500_v35 = vsel %vm201_vm0, %v1498_v21, -1e+30  ;;  %v1812_v21 = vld [vmem:[%s4802_s2 + $0x68] sm:$0xff] }
 0x416   : > { %1506 = vmax.xlane.f32.xlu1 %v1505_v58  ;;  %v1502_v59 = vsel %vm1133_vm1, %v1500_v35, -inf }
 0x417   : > { %1503 = vmax.xlane.f32.xlu0 %v1502_v59  ;;  %v1813_v59 = vld [vmem:[%s4802_s2 + $0x70] sm:$0xff] }
 0x4a3   : > { %v1507_v60 = vpop.xlane.xlu1 %1506 }
 0x4a4   : > { %v1509_v61 = vsub.f32 %v1501_v27, %v1507_v60  ;;  %v1504_v62 = vpop.xlane.xlu0 %1503  ;;  %v2708_v27 = vpack.c.bf16 %v1809_v57, %v1807_v56  ;;  %v1816_v60 = vld [vmem:[%s4802_s2 + $0x88] sm:$0xff]  ;;  %v1850_v56 = vld [vmem:[%s4802_s2 + $0x198] sm:$0xff] }
 0x4a5   : > { %v1508_v13 = vsub.f32 %v1500_v35, %v1504_v62  ;;  %v1811_v35 = vld [vmem:[%s4802_s2 + $0x60] sm:$0xff] }
 0x4a6   : > { %v1512_v19 = vmul.f32 1.442695, %v1509_v61  ;;  %v1818_v61 = vld [vmem:[%s4802_s2 + $0x98] sm:$0xff]  ;;  %v2712_v62 = vpack.c.bf16 %v1813_v59, %v1811_v35 }
 0x4a7   : > { %v1510_v0 = vmul.f32 1.442695, %v1508_v13  ;;  %v2714_v13 = vpack.c.bf16 %v1818_v61, %v1816_v60  ;;  %v1851_v61 = vld [vmem:[%s4802_s2 + $0x1a0] sm:$0xff] }
 0x4a9   : > { %2883 = vpow2.f32 %v1510_v0  ;;  %v1817_v0 = vld [vmem:[%s4802_s2 + $0x90] sm:$0xff] }
 0x4aa   : > { %2885 = vpow2.f32 %v1512_v19  ;;  %v1815_v19 = vld [vmem:[%s4802_s2 + $0x80] sm:$0xff] }
 0x4b3   : > { %v2884_v1 = vpop.eup %2883 }
 0x4b4   : > { %v2886_v2 = vpop.eup %2885  ;;  %2265 = vmatprep.mubr.msk.f32.mxu0 %vm1133_vm1, %v2884_v1  ;;  %v1514_v15 = vsel %vm1133_vm1, %v2884_v1, 0.0  ;;  %v1820_v1 = vld [vmem:[%s4802_s2 + $0xa8] sm:$0xff] }
 0x4b5   : > { %2266 = vmatmul.mubr.msk.f32.vlgmr.msra.gmra.mrb[20].mxu0 %vm1133_vm1, %v2886_v2  ;;  %v1517_v63 = vsel %vm1133_vm1, %v2886_v2, 0.0  ;;  %v1822_v2 = vld [vmem:[%s4802_s2 + $0xb8] sm:$0xff] }
 0x4b6   : > { %2693 = vmatpush3.bf16.xpose.msra.mxu0 %v4302_v40  ;;  %2272 = vmatprep.mubr.f32.mxu0 %v4007_v31 }
 0x4bd   : > { %2273 = vmatmul.mubr.f32.vlgmr.msra.gmra.mrb[22].mxu0 %v4023_v39 }
 0x588   : > { %v4333_v3 = vpop.f32.mrb[20].mxu0 }
 0x589   : > { %v4335_v4 = vpop.f32.mrb[21].mxu0 }
 0x590   : > { %v2274_v5 = vpop.f32.mrb[22].mxu0 }
 0x591   : > { %v1683_v6 = vmul.f32 0.16903085, %v2274_v5  ;;  %v1673_v7 = vpop.f32.mrb[23].mxu0  ;;  %v2716_v5 = vpack.c.bf16 %v1817_v0, %v1815_v19  ;;  %v1856_v19 = vld [vmem:[%s4802_s2 + $0x1c8] sm:$0xff]  ;;  %v1858_v0 = vld [vmem:[%s4802_s2 + $0x1d8] sm:$0xff] }
 0x592   : > { %v1682_v8 = vmul.f32 0.16903085, %v1673_v7  ;;  %v1819_v7 = vld [vmem:[%s4802_s2 + $0xa0] sm:$0xff] }
 0x593   : > { %v1685_v9 = vsel %vm202_vm2, %v1683_v6, -1e+30  ;;  %v2718_v6 = vpack.c.bf16 %v1822_v2, %v1820_v1 }
 0x594   : > { %v1689_v41 = vsel %vm1133_vm1, %v1685_v9, -inf  ;;  %v1684_v31 = vsel %vm201_vm0, %v1682_v8, -1e+30  ;;  %v1821_v8 = vld [vmem:[%s4802_s2 + $0xb0] sm:$0xff] }
 0x595   : > { %1690 = vmax.xlane.f32.xlu1 %v1689_v41  ;;  %v1686_v39 = vsel %vm1133_vm1, %v1684_v31, -inf  ;;  %v1826_v41 = vld [vmem:[%s4802_s2 + $0xd8] sm:$0xff] }
 0x596   : > { %1687 = vmax.xlane.f32.xlu0 %v1686_v39 }
 0x599   : > { %1147 = vadd.xlane.f32.xlu1 %v1146_v10  ;;  %v1823_v10 = vld [vmem:[%s4802_s2 + $0xc0] sm:$0xff] }
 0x59a   : > { %1331 = vadd.xlane.f32.xlu0 %v1330_v12  ;;  %v1825_v12 = vld [vmem:[%s4802_s2 + $0xd0] sm:$0xff] }
 0x59d   : > { %1150 = vadd.xlane.f32.xlu1 %v1149_v14  ;;  %v1828_v14 = vld [vmem:[%s4802_s2 + $0xe8] sm:$0xff] }
 0x59e   : > { %1334 = vadd.xlane.f32.xlu0 %v1333_v11  ;;  %v1830_v11 = vld [vmem:[%s4802_s2 + $0xf8] sm:$0xff] }
 0x5a1   : > { %1515 = vadd.xlane.f32.xlu1 %v1514_v15  ;;  %v2724_v15 = vpack.c.bf16 %v1825_v12, %v1823_v10  ;;  %v1861_v10 = vld [vmem:[%s4802_s2 + $0x1f0] sm:$0xff]  ;;  %v1864_v12 = vld [vmem:[%s4802_s2 + $0x208] sm:$0xff] }
 0x5a5   : > { %1518 = vadd.xlane.f32.xlu1 %v1517_v63  ;;  %v2726_v63 = vpack.c.bf16 %v1830_v11, %v1828_v14  ;;  %v1866_v14 = vld [vmem:[%s4802_s2 + $0x218] sm:$0xff] }
 0x622   : > { %v1691_v23 = vpop.xlane.xlu1 %1690 }
 0x623   : > { %v1693_v40 = vsub.f32 %v1685_v9, %v1691_v23  ;;  %v1688_v46 = vpop.xlane.xlu0 %1687  ;;  %v1824_v9 = vld [vmem:[%s4802_s2 + $0xc8] sm:$0xff]  ;;  %v1834_v23 = vld [vmem:[%s4802_s2 + $0x118] sm:$0xff] }
 0x624   : > { %v1692_v50 = vsub.f32 %v1684_v31, %v1688_v46  ;;  %v2720_v31 = vpack.c.bf16 %v1821_v8, %v1819_v7  ;;  %v2722_v39 = vpack.c.bf16 %v1826_v41, %v1824_v9  ;;  %v2730_v46 = vpack.c.bf16 %v1834_v23, %v1832_v18  ;;  %v1857_v7 = vld [vmem:[%s4802_s2 + $0x1d0] sm:$0xff]  ;;  %v1860_v8 = vld [vmem:[%s4802_s2 + $0x1e8] sm:$0xff]  ;;  %v1862_v9 = vld [vmem:[%s4802_s2 + $0x1f8] sm:$0xff] }
 0x625   : > { %v1696_v24 = vmul.f32 1.442695, %v1693_v40  ;;  %v2728_v40 = vpack.c.bf16 %v1829_v17, %v1827_v16  ;;  %v1865_v16 = vld [vmem:[%s4802_s2 + $0x210] sm:$0xff]  ;;  %v1868_v18 = vld [vmem:[%s4802_s2 + $0x228] sm:$0xff]  ;;  %v1870_v23 = vld [vmem:[%s4802_s2 + $0x238] sm:$0xff] }
 0x626   : > { %v1694_v25 = vmul.f32 1.442695, %v1692_v50  ;;  %v1831_v50 = vld [vmem:[%s4802_s2 + $0x100] sm:$0xff]  ;;  %v1148_v35 = vpop.xlane.xlu1 %1147 }
 0x627   : > { %v1332_v26 = vpop.xlane.xlu0 %1331 }
 0x628   : > { %2887 = vpow2.f32 %v1694_v25  ;;  %v1836_v25 = vld [vmem:[%s4802_s2 + $0x128] sm:$0xff] }
 0x629   : > { %2889 = vpow2.f32 %v1696_v24  ;;  %v1833_v24 = vld [vmem:[%s4802_s2 + $0x110] sm:$0xff] }
 0x62a   : > { %2891 = vrcp.f32 %v1332_v26  ;;  %v1838_v26 = vld [vmem:[%s4802_s2 + $0x138] sm:$0xff]  ;;  %v2732_v28 = vpack.c.bf16 %v1833_v24, %v1831_v50  ;;  %v1151_v2 = vpop.xlane.xlu1 %1150  ;;  %v2766_v24 = vpack.c.bf16 %v1870_v23, %v1868_v18 }
 0x62b   : > { %v2734_v29 = vpack.c.bf16 %v1838_v26, %v1836_v25  ;;  %2893 = vrcp.f32 %v1148_v35  ;;  %v1867_v25 = vld [vmem:[%s4802_s2 + $0x220] sm:$0xff]  ;;  %v1869_v26 = vld [vmem:[%s4802_s2 + $0x230] sm:$0xff]  ;;  %v1888_v35 = vld [vmem:[%s4802_s2 + $0x2c8] sm:$0xff] }
 0x632   : > { %v2888_v34 = vpop.eup %2887 }
 0x633   : > { %v2890_v42 = vpop.eup %2889  ;;  %2279 = vmatprep.mubr.msk.f32.mxu1 %vm1133_vm1, %v2888_v34  ;;  %v1698_v43 = vsel %vm1133_vm1, %v2888_v34, 0.0  ;;  %v1842_v34 = vld [vmem:[%s4802_s2 + $0x158] sm:$0xff] }
 0x634   : > { %v2892_v47 = vpop.eup %2891  ;;  %2280 = vmatmul.mubr.msk.f32.vlgmr.msra.gmra.mrb[14].mxu1 %vm1133_vm1, %v2890_v42  ;;  %1699 = vadd.xlane.f32.xlu0 %v1698_v43  ;;  %v1701_v20 = vsel %vm1133_vm1, %v2890_v42, 0.0  ;;  %v1841_v42 = vld [vmem:[%s4802_s2 + $0x150] sm:$0xff]  ;;  %v1844_v43 = vld [vmem:[%s4802_s2 + $0x168] sm:$0xff] }
 0x635   : > { %2701 = vmatpush1.bf16.msra.mxu1 %v2700_v33  ;;  %v1419_v48 = vmul.f32 %v2892_v47, %v4318_v55  ;;  %v1814_v55 = vld [vmem:[%s4802_s2 + $0x78] sm:$0xff]  ;;  %v1840_v33 = vld [vmem:[%s4802_s2 + $0x148] sm:$0xff]  ;;  %v2740_v45 = vpack.c.bf16 %v1841_v42, %v1839_v38  ;;  %v2742_v47 = vpack.c.bf16 %v1846_v44, %v1844_v43  ;;  %v2894_v17 = vpop.eup %2893  ;;  %v1875_v43 = vld [vmem:[%s4802_s2 + $0x260] sm:$0xff] }
 0x636   : > { %2703 = vmatprep.subr.bf16.mxu1 %v2702_v36  ;;  %v2710_v58 = vpack.c.bf16 %v1814_v55, %v1812_v21  ;;  %v2736_v36 = vpack.c.bf16 %v1837_v32, %v1835_v30  ;;  %v2738_v37 = vpack.c.bf16 %v1842_v34, %v1840_v33  ;;  %v1847_v21 = vld [vmem:[%s4802_s2 + $0x180] sm:$0xff]  ;;  %v1849_v55 = vld [vmem:[%s4802_s2 + $0x190] sm:$0xff]  ;;  %v1235_v50 = vmul.f32 %v2894_v17, %v4314_v53  ;;  %v1872_v30 = vld [vmem:[%s4802_s2 + $0x248] sm:$0xff] }
 0x637   : > { %2002 = vmatprep.mubr.f32.mxu1 %v1419_v48  ;;  %v1843_v48 = vld [vmem:[%s4802_s2 + $0x160] sm:$0xff]  ;;  %v2748_v59 = vpack.c.bf16 %v1849_v55, %v1847_v21  ;;  %v1874_v53 = vld [vmem:[%s4802_s2 + $0x258] sm:$0xff]  ;;  %v2768_v32 = vpack.c.bf16 %v1869_v26, %v1867_v25  ;;  %v1877_v44 = vld [vmem:[%s4802_s2 + $0x270] sm:$0xff] }
 0x638   : > { %1702 = vadd.xlane.f32.xlu0 %v1701_v20  ;;  %v2770_v34 = vpack.c.bf16 %v1874_v53, %v1872_v30  ;;  %v1878_v38 = vld [vmem:[%s4802_s2 + $0x278] sm:$0xff]  ;;  %v1912_v30 = vld [vmem:[%s4802_s2 + $0x388] sm:$0xff] }
 0x639   : > { %2705 = vmatpush1.bf16.msra.mxu1 %v2704_v49  ;;  %v1845_v49 = vld [vmem:[%s4802_s2 + $0x170] sm:$0xff]  ;;  %v1906_v17 = vld [vmem:[%s4802_s2 + $0x358] sm:$0xff] }
 0x63a   : > { %2707 = vmatprep.subr.bf16.mxu1 %v2706_v51  ;;  %v1848_v51 = vld [vmem:[%s4802_s2 + $0x188] sm:$0xff]  ;;  %v2744_v57 = vpack.c.bf16 %v1845_v49, %v1843_v48  ;;  %v2776_v48 = vpack.c.bf16 %v1877_v44, %v1875_v43  ;;  %v1914_v53 = vld [vmem:[%s4802_s2 + $0x398] sm:$0xff]  ;;  %v1917_v43 = vld [vmem:[%s4802_s2 + $0x3b0] sm:$0xff] }
 0x63b   : > { %v2746_v20 = vpack.c.bf16 %v1850_v56, %v1848_v51  ;;  %v1879_v51 = vld [vmem:[%s4802_s2 + $0x280] sm:$0xff]  ;;  %v1881_v56 = vld [vmem:[%s4802_s2 + $0x290] sm:$0xff]  ;;  %v1920_v44 = vld [vmem:[%s4802_s2 + $0x3c8] sm:$0xff] }
 0x63c   : > { %v2780_v21 = vpack.c.bf16 %v1881_v56, %v1879_v51  ;;  %v1921_v51 = vld [vmem:[%s4802_s2 + $0x3d0] sm:$0xff]  ;;  %v1924_v56 = vld [vmem:[%s4802_s2 + $0x3e8] sm:$0xff] }
 0x63d   : > { %2709 = vmatpush1.bf16.msra.mxu1 %v2708_v27  ;;  %v1852_v27 = vld [vmem:[%s4802_s2 + $0x1a8] sm:$0xff] }
 0x63e   : > { %2711 = vmatprep.subr.bf16.mxu1 %v2710_v58  ;;  %v1854_v58 = vld [vmem:[%s4802_s2 + $0x1b8] sm:$0xff] }
 0x63f   : > { %v2750_v60 = vpack.c.bf16 %v1854_v58, %v1852_v27  ;;  %v1883_v27 = vld [vmem:[%s4802_s2 + $0x2a0] sm:$0xff]  ;;  %v1885_v58 = vld [vmem:[%s4802_s2 + $0x2b0] sm:$0xff] }
 0x641   : > { %2713 = vmatpush1.bf16.msra.mxu1 %v2712_v62  ;;  %v1853_v62 = vld [vmem:[%s4802_s2 + $0x1b0] sm:$0xff] }
 0x642   : > { %2715 = vmatprep.subr.bf16.mxu1 %v2714_v13  ;;  %v1335_v13 = vpop.xlane.xlu0 %1334  ;;  %v2752_v1 = vpack.c.bf16 %v1853_v62, %v1851_v61  ;;  %v1887_v62 = vld [vmem:[%s4802_s2 + $0x2c0] sm:$0xff] }
 0x643   : > { %2895 = vrcp.f32 %v1335_v13  ;;  %v1889_v13 = vld [vmem:[%s4802_s2 + $0x2d0] sm:$0xff] }
 0x644   : > { %2897 = vrcp.f32 %v1151_v2 }
 0x645   : > { %2717 = vmatpush1.bf16.msra.mxu1 %v2716_v5  ;;  %v2754_v5 = vpack.c.bf16 %v1858_v0, %v1856_v19  ;;  %v1892_v19 = vld [vmem:[%s4802_s2 + $0x2e8] sm:$0xff]  ;;  %v1894_v0 = vld [vmem:[%s4802_s2 + $0x2f8] sm:$0xff] }
 0x646   : > { %2719 = vmatprep.subr.bf16.mxu1 %v2718_v6  ;;  %v1855_v6 = vld [vmem:[%s4802_s2 + $0x1c0] sm:$0xff]  ;;  %v2790_v2 = vpack.c.bf16 %v1894_v0, %v1892_v19 }
 0x647   : > { %v2756_v41 = vpack.c.bf16 %v1857_v7, %v1855_v6  ;;  %v1893_v6 = vld [vmem:[%s4802_s2 + $0x2f0] sm:$0xff]  ;;  %v1896_v7 = vld [vmem:[%s4802_s2 + $0x308] sm:$0xff] }
 0x649   : > { %2721 = vmatpush1.bf16.msra.mxu1 %v2720_v31  ;;  %v2758_v31 = vpack.c.bf16 %v1862_v9, %v1860_v8  ;;  %v1898_v8 = vld [vmem:[%s4802_s2 + $0x318] sm:$0xff] }
 0x64a   : > { %2723 = vmatprep.subr.bf16.mxu1 %v2722_v39  ;;  %v1859_v39 = vld [vmem:[%s4802_s2 + $0x1e0] sm:$0xff] }
 0x64b   : > { %v2760_v11 = vpack.c.bf16 %v1861_v10, %v1859_v39  ;;  %v1897_v39 = vld [vmem:[%s4802_s2 + $0x310] sm:$0xff]  ;;  %v1900_v10 = vld [vmem:[%s4802_s2 + $0x328] sm:$0xff] }
 0x64d   : > { %2725 = vmatpush1.bf16.msra.mxu1 %v2724_v15  ;;  %v2762_v15 = vpack.c.bf16 %v1866_v14, %v1864_v12  ;;  %v1902_v12 = vld [vmem:[%s4802_s2 + $0x338] sm:$0xff] }
 0x64e   : > { %2727 = vmatprep.subr.bf16.mxu1 %v2726_v63  ;;  %v1863_v63 = vld [vmem:[%s4802_s2 + $0x200] sm:$0xff] }
 0x651   : > { %2729 = vmatpush1.bf16.msra.mxu1 %v2728_v40  ;;  %v2896_v40 = vpop.eup %2895 }
 0x652   : > { %2731 = vmatprep.subr.bf16.mxu1 %v2730_v46  ;;  %v2764_v46 = vpack.c.bf16 %v1865_v16, %v1863_v63  ;;  %v1901_v63 = vld [vmem:[%s4802_s2 + $0x330] sm:$0xff]  ;;  %v1904_v16 = vld [vmem:[%s4802_s2 + $0x348] sm:$0xff] }
 0x653   : > { %v2802_v23 = vpack.c.bf16 %v1906_v17, %v1904_v16 }
 0x655   : > { %2733 = vmatpush1.bf16.msra.mxu1 %v2732_v28  ;;  %v2898_v28 = vpop.eup %2897 }
 0x656   : > { %2735 = vmatprep.subr.bf16.mxu1 %v2734_v29  ;;  %v1420_v29 = vmul.f32 %v2896_v40, %v4316_v54  ;;  %v1236_v33 = vmul.f32 %v2898_v28, %v4312_v52  ;;  %v1871_v54 = vld [vmem:[%s4802_s2 + $0x240] sm:$0xff] }
 0x657   : > { %v1903_v40 = vld [vmem:[%s4802_s2 + $0x340] sm:$0xff] }
 0x658   : > { %v1907_v28 = vld [vmem:[%s4802_s2 + $0x360] sm:$0xff] }
 0x659   : > { %2737 = vmatpush1.bf16.msra.mxu1 %v2736_v36  ;;  %v1873_v36 = vld [vmem:[%s4802_s2 + $0x250] sm:$0xff] }
 0x65a   : > { %2739 = vmatprep.subr.bf16.mxu1 %v2738_v37  ;;  %v1876_v37 = vld [vmem:[%s4802_s2 + $0x268] sm:$0xff]  ;;  %v2772_v52 = vpack.c.bf16 %v1873_v36, %v1871_v54  ;;  %v1913_v54 = vld [vmem:[%s4802_s2 + $0x390] sm:$0xff] }
 0x65b   : > { %v2774_v42 = vpack.c.bf16 %v1878_v38, %v1876_v37  ;;  %v1916_v36 = vld [vmem:[%s4802_s2 + $0x3a8] sm:$0xff]  ;;  %v1918_v37 = vld [vmem:[%s4802_s2 + $0x3b8] sm:$0xff] }
 0x65d   : > { %2741 = vmatpush1.bf16.msra.mxu1 %v2740_v45  ;;  %v1880_v45 = vld [vmem:[%s4802_s2 + $0x288] sm:$0xff] }
 0x65e   : > { %2743 = vmatprep.subr.bf16.mxu1 %v2742_v47  ;;  %v1882_v47 = vld [vmem:[%s4802_s2 + $0x298] sm:$0xff] }
 0x65f   : > { %v2778_v49 = vpack.c.bf16 %v1882_v47, %v1880_v45  ;;  %v1922_v45 = vld [vmem:[%s4802_s2 + $0x3d8] sm:$0xff] }
 0x661   : > { %2745 = vmatpush1.bf16.msra.mxu1 %v2744_v57  ;;  %v1884_v57 = vld [vmem:[%s4802_s2 + $0x2a8] sm:$0xff] }
 0x662   : > { %2747 = vmatprep.subr.bf16.mxu1 %v2746_v20  ;;  %v1886_v20 = vld [vmem:[%s4802_s2 + $0x2b8] sm:$0xff] }
 0x663   : > { %v2782_v55 = vpack.c.bf16 %v1886_v20, %v1884_v57  ;;  %v1926_v57 = vld [vmem:[%s4802_s2 + $0x3f8] sm:$0xff] }
 0x665   : > { %2749 = vmatpush1.bf16.msra.mxu1 %v2748_v59  ;;  %v1890_v59 = vld [vmem:[%s4802_s2 + $0x2d8] sm:$0xff] }
 0x666   : > { %2751 = vmatprep.subr.bf16.mxu1 %v2750_v60  ;;  %v2784_v60 = vpack.c.bf16 %v1885_v58, %v1883_v27  ;;  %v2786_v61 = vpack.c.bf16 %v1890_v59, %v1888_v35  ;;  %v1925_v27 = vld [vmem:[%s4802_s2 + $0x3f0] sm:$0xff]  ;;  %v1516_v59 = vpop.xlane.xlu1 %1515 }
 0x667   : > { %2899 = vrcp.f32 %v1516_v59 }
 0x669   : > { %2753 = vmatpush1.bf16.msra.mxu1 %v2752_v1  ;;  %v2788_v1 = vpack.c.bf16 %v1889_v13, %v1887_v62 }
 0x66a   : > { %2755 = vmatprep.subr.bf16.mxu1 %v2754_v5  ;;  %v1891_v5 = vld [vmem:[%s4802_s2 + $0x2e0] sm:$0xff] }
 0x66b   : > { %v2792_v9 = vpack.c.bf16 %v1893_v6, %v1891_v5 }
 0x66d   : > { %2757 = vmatpush1.bf16.msra.mxu1 %v2756_v41  ;;  %v2794_v41 = vpack.c.bf16 %v1898_v8, %v1896_v7 }
 0x66e   : > { %2759 = vmatprep.subr.bf16.mxu1 %v2758_v31  ;;  %v1895_v31 = vld [vmem:[%s4802_s2 + $0x300] sm:$0xff] }
 0x66f   : > { %v2796_v14 = vpack.c.bf16 %v1897_v39, %v1895_v31  ;;  %v1934_v31 = vsub.s32 1, %v4275_v22 }
 0x671   : > { %2761 = vmatpush1.bf16.msra.mxu1 %v2760_v11  ;;  %v2798_v11 = vpack.c.bf16 %v1902_v12, %v1900_v10  ;;  %v2900_v62 = vpop.eup %2899 }
 0x672   : > { %2763 = vmatprep.subr.bf16.mxu1 %v2762_v15  ;;  %v1899_v15 = vld [vmem:[%s4802_s2 + $0x320] sm:$0xff]  ;;  %v1603_v5 = vmul.f32 %v2900_v62, %v4335_v4 }
 0x673   : > { %v2800_v18 = vpack.c.bf16 %v1901_v63, %v1899_v15 }
 0x674   : > { %2003 = vmatmul.mubr.f32.vlgmr.msra.gmra.mrb[16].mxu1 %v1235_v50  ;;  %v1908_v50 = vld [vmem:[%s4802_s2 + $0x368] sm:$0xff] }
 0x675   : > { %2008 = vmatprep.mubr.f32.mxu1 %v1420_v29  ;;  %2765 = vmatpush1.bf16.msra.mxu1 %v2764_v46  ;;  %v1905_v46 = vld [vmem:[%s4802_s2 + $0x350] sm:$0xff] }
 0x676   : > { %2767 = vmatprep.subr.bf16.mxu1 %v2766_v24  ;;  %v1910_v24 = vld [vmem:[%s4802_s2 + $0x378] sm:$0xff]  ;;  %v2804_v25 = vpack.c.bf16 %v1905_v46, %v1903_v40  ;;  %v1909_v29 = vld [vmem:[%s4802_s2 + $0x370] sm:$0xff] }
 0x677   : > { %v2806_v26 = vpack.c.bf16 %v1910_v24, %v1908_v50 }
 0x678   : > { %2009 = vmatmul.mubr.f32.gmra.mrb[18].mxu1 %v1236_v33  ;;  %v2810_v33 = vpack.c.bf16 %v1914_v53, %v1912_v30 }
 0x679   : > { %2769 = vmatpush1.bf16.msra.mxu1 %v2768_v32  ;;  %v2808_v32 = vpack.c.bf16 %v1909_v29, %v1907_v28 }
 0x67a   : > { %2771 = vmatprep.subr.bf16.mxu1 %v2770_v34  ;;  %v1911_v34 = vld [vmem:[%s4802_s2 + $0x380] sm:$0xff] }
 0x67b   : > { %v2812_v38 = vpack.c.bf16 %v1913_v54, %v1911_v34 }
 0x67d   : > { %2773 = vmatpush1.bf16.msra.mxu1 %v2772_v52  ;;  %v2814_v52 = vpack.c.bf16 %v1918_v37, %v1916_v36 }
 0x67e   : > { %2775 = vmatprep.subr.bf16.mxu1 %v2774_v42  ;;  %v1915_v42 = vld [vmem:[%s4802_s2 + $0x3a0] sm:$0xff] }
 0x67f   : > { %v2816_v47 = vpack.c.bf16 %v1917_v43, %v1915_v42 }
 0x681   : > { %2777 = vmatpush1.bf16.msra.mxu1 %v2776_v48  ;;  %v2818_v48 = vpack.c.bf16 %v1922_v45, %v1920_v44 }
 0x682   : > { %2779 = vmatprep.subr.bf16.mxu1 %v2778_v49  ;;  %v1919_v49 = vld [vmem:[%s4802_s2 + $0x3c0] sm:$0xff] }
 0x683   : > { %v2820_v20 = vpack.c.bf16 %v1921_v51, %v1919_v49 }
 0x685   : > { %2781 = vmatpush1.bf16.msra.mxu1 %v2780_v21  ;;  %v2822_v21 = vpack.c.bf16 %v1926_v57, %v1924_v56 }
 0x686   : > { %2783 = vmatprep.subr.bf16.mxu1 %v2782_v55  ;;  %v1923_v55 = vld [vmem:[%s4802_s2 + $0x3e0] sm:$0xff] }
 0x687   : > { %v2824_v58 = vpack.c.bf16 %v1925_v27, %v1923_v55 }
 0x689   : > { %2785 = vmatpush1.bf16.msra.mxu1 %v2784_v60 }
 0x68a   : > { %2787 = vmatprep.subr.bf16.mxu1 %v2786_v61  ;;  %v1519_v61 = vpop.xlane.xlu1 %1518 }
 0x68d   : > { %2789 = vmatpush1.bf16.msra.mxu1 %v2788_v1 }
 0x68e   : > { %2791 = vmatprep.subr.bf16.mxu1 %v2790_v2 }
 0x691   : > { %2793 = vmatpush1.bf16.msra.mxu1 %v2792_v9  ;;  %v1930_v9 = vsub.s32 0, %v4275_v22 }
 0x692   : > { %2795 = vmatprep.subr.bf16.mxu1 %v2794_v41  ;;  %v203_v41 = vld [vmem:[%s4803_s3] sm:$0x3] }
 0x693   : > { %v1931_v4 = vrot.slane %v203_v41, %v1930_v9  ;;  %v1935_v39 = vrot.slane %v203_v41, %v1934_v31 }
 0x695   : > { %2797 = vmatpush1.bf16.msra.mxu1 %v2796_v14 }
 0x696   : > { %2799 = vmatprep.subr.bf16.mxu1 %v2798_v11 }
 0x699   : > { %2801 = vmatpush1.bf16.msra.mxu1 %v2800_v18 }
 0x69a   : > { %2803 = vmatprep.subr.bf16.mxu1 %v2802_v23 }
 0x69d   : > { %2805 = vmatpush1.bf16.msra.mxu1 %v2804_v25 }
 0x69e   : > { %2807 = vmatprep.subr.bf16.mxu1 %v2806_v26 }
 0x6a1   : > { %2809 = vmatpush1.bf16.msra.mxu1 %v2808_v32 }
 0x6a2   : > { %2811 = vmatprep.subr.bf16.mxu1 %v2810_v33 }
 0x6a5   : > { %2813 = vmatpush1.bf16.msra.mxu1 %v2812_v38 }
 0x6a6   : > { %2815 = vmatprep.subr.bf16.mxu1 %v2814_v52 }
 0x6a9   : > { %2817 = vmatpush1.bf16.msra.mxu1 %v2816_v47 }
 0x6aa   : > { %2819 = vmatprep.subr.bf16.mxu1 %v2818_v48 }
 0x6ad   : > { %2821 = vmatpush1.bf16.msra.mxu1 %v2820_v20 }
 0x6ae   : > { %2823 = vmatprep.subr.bf16.mxu1 %v2822_v21 }
 0x6b1   : > { %2825 = vmatpush1.bf16.msra.mxu1 %v2824_v58 }
 0x6c1   : > { %v1700_v35 = vpop.xlane.xlu0 %1699 }
 0x6c2   : > { %2901 = vrcp.f32 %v1700_v35 }
 0x6c5   : > { %v1703_v60 = vpop.xlane.xlu0 %1702 }
 0x6c6   : > { %2903 = vrcp.f32 %v1703_v60 }
 0x6c7   : > { %2905 = vrcp.f32 %v1519_v61 }
 0x6cc   : > { %v2902_v19 = vpop.eup %2901 }
 0x6d0   : > { %v2904_v2 = vpop.eup %2903 }
 0x6d1   : > { %v2906_v6 = vpop.eup %2905 }
 0x6d2   : > { %v1604_v8 = vmul.f32 %v2906_v6, %v4333_v3 }
 0x707   : > { %v2281_v13 = vpop.f32.mrb[14].mxu1 }
 0x708   : > { %v1776_v0 = vpop.f32.mrb[15].mxu1  ;;  %v1788_v7 = vmul.f32 %v2904_v2, %v2281_v13 }
 0x709   : > { %v1787_v1 = vmul.f32 %v2902_v19, %v1776_v0 }
 0x70b   : > { %2079 = vmatprep.mubr.f32.mxu1 %v1787_v1 }
 0x70c   : > { %2080 = vmatmul.mubr.f32.vlgmr.msra.gmra.mrb[16].mxu1 %v1603_v5 }
 0x70d   : > { %2085 = vmatprep.mubr.f32.mxu1 %v1788_v7 }
 0x710   : > { %2086 = vmatmul.mubr.f32.gmra.mrb[18].mxu1 %v1604_v8 }
 0x7df   : > { %v2081_v10 = vpop.f32.mrb[16].mxu1 }
 0x7e0   : > { %v2826_v12 = vadd.f32 %v2081_v10, %v1931_v4  ;;  %v2083_v14 = vpop.f32.mrb[17].mxu1 }
 0x7e1   : > { %v2827_v3 = vadd.f32 %v2083_v14, %v1935_v39 }
 0x7e2   : > { %2092 = vst [vmem:[%s190_s27] sm:$0xff] %v2826_v12 }
 0x7e3   : > { %2093 = vst [vmem:[%s190_s27 + $0x8] sm:$0xff] %v2827_v3  ;;  %v2087_v11 = vpop.f32.mrb[18].mxu1 }
 0x7e4   : > { %v2828_v22 = vadd.f32 %v2087_v11, %v1931_v4  ;;  %v2089_v15 = vpop.f32.mrb[19].mxu1 }
 0x7e5   : > { %v2829_v63 = vadd.f32 %v2089_v15, %v1935_v39 }
 0x7e6   : > { %2094 = vst [vmem:[%s190_s27 + $0x10] sm:$0xff] %v2828_v22 }
 0x7e7   : > { %2095 = vst [vmem:[%s190_s27 + $0x18] sm:$0xff] %v2829_v63 }
 0x7e8   : > { %2924 = shalt.err (!%p2921_p3)
}
 0x7e9   : > { %s2925_s11 = scalar_lea.hbm %s4757_s6, 512  ;;  %s2929_s14 = scalar_lea.hbm %s4804_s4, 1024 }
 0x7ea   : > { %p2926_p4 = scmp.ne.s32.totalorder %s4757_s6, %s2925_s11  ;;  %p2930_p9 = scmp.lt.u32.totalorder %s4757_s6, %s4804_s4 }
 0x7eb   : > { %p2931_p10 = scmp.lt.u32.totalorder %s2929_s14, %s2925_s11  ;;  %p2933_p12 = scmp.lt.u32.totalorder %s2925_s11, %s4757_s6 }
 0x7ec   : > { %p2927_p7 = pnand %p2926_p4, %p3041_p5 }
 0x7ed   : > { %p2932_p11 = por %p2931_p10, %p2930_p9 }
 0x7ee   : > { %p2928_p8 = pneg %p2927_p7 }
 0x7ef   : > { %p2934_p13 = por %p2933_p12, %p2932_p11 }
 0x7f1   : > { %p2935_p0 = pnand %p2934_p13, %p2928_p8 }
 0x7f3   : > { %2938 = shalt.err (!%p2935_p0)
}
 0x7f4   : > { %s2976_s23 = smov 256   ;;  %s2977_s27 = smov 16  }
 0x7f5   : > { %2834 = dma.vmem_to_hbm [thread:$0]  (%p3041_p5), %s4752_s28, 512, %s4757_s6, %s4759_s7, %s2976_s23, %s2976_s23, %s2977_s27  }
 0x7f6 PF: > { %p2840_p1 = scmp.ge.s32.totalorder %s2973_s18, 2  ;;  %s2125_s30 = sand.u32 1, %s2961_s15  }
 0x7f7   : > { %s2126_s29 = scalar_lea.sflag [#allocation4], %s2125_s30 }
 0x7f8   : > { %p2837_p2 = pnand %p2840_p1, %p3045_p6 }
 0x7fa   : > { %2956 = dma.done.wait (!%p2837_p2), %s2126_s29, 512  }
 0x7fb   : > { %2958 = vsyncadd (!%p2837_p2), %s2126_s29, 4294966784  ;;  %p14_p3 = scmp.ge.s32.totalorder %s3028_s21, 4   ;;  %s4807_s15 = smov %s2965_s16 }
 0x7fc   : > { %s4808_s16 = smov %s2969_s17  ;;  %s4809_s17 = smov %s3039_s24 }
 0x7fd   : > { %s4810_s18 = smov %s3028_s21  ;;  %16 = sbr.rel (!%p14_p3) target bundleno = 3 (0x3), region = 71 }
 0x804   :  { %2131 = vsyncpa [#allocation4], 1 }
 0x805   :  { %2133 = vsyncpa [#allocation4 + $0x1], 1 }

</bundles_post_ra>
